<compile_context>
chip_gen: v7x
topology: tpu7x:2x2x1
jax: 0.10.0
libtpu: 0.0.40
codegen_flags: <defaults>
</compile_context>

<pallas_src>
import functools

import jax
import jax.numpy as jnp
from jax.experimental import pallas as pl
from jax.experimental.pallas import tpu as pltpu

D_NOISE = 100
D_HIDDEN = 256
D_OUT = 28 * 28  # 784 (= 6*128 + 16; lane-padding to 896 is optional polish)


def g_kernel(x_ref, w1_ref, b1_ref, w2_ref, b2_ref, w3_ref, b3_ref, o_ref):
    # Layer 1: Linear(100 -> 256) + ReLU   (Dropout = identity in eval mode)
    h = jnp.dot(x_ref[...], w1_ref[...], preferred_element_type=jnp.float32)
    h = jnp.maximum(h + b1_ref[...], 0.0)
    # Layer 2: Linear(256 -> 256) + ReLU   (Dropout = identity in eval mode)
    h = jnp.dot(h.astype(jnp.bfloat16), w2_ref[...],
                preferred_element_type=jnp.float32)
    h = jnp.maximum(h + b2_ref[...], 0.0)
    # Layer 3: Linear(256 -> 784) + Tanh
    h = jnp.dot(h.astype(jnp.bfloat16), w3_ref[...],
                preferred_element_type=jnp.float32)
    o_ref[...] = jnp.tanh(h + b3_ref[...]).astype(o_ref.dtype)


@functools.partial(jax.jit, static_argnames=("tb",))
def generator_forward(x, params, *, tb=512):
    """x: (B, 100) fp32. params: pre-transposed (in, out) fp32 weights, (1, out) biases."""
    B = x.shape[0]
    num_tiles = pl.cdiv(B, tb)
    b_pad = num_tiles * tb
    if b_pad != B:
        x = jnp.pad(x, ((0, b_pad - B), (0, 0)))

    # Cast matmul operands to bf16 once (f32 accumulation happens in-kernel).
    x_bf = x.astype(jnp.bfloat16)
    w1 = params["w1"].astype(jnp.bfloat16)
    w2 = params["w2"].astype(jnp.bfloat16)
    w3 = params["w3"].astype(jnp.bfloat16)
    b1, b2, b3 = params["b1"], params["b2"], params["b3"]

    resident = lambda shape: pl.BlockSpec(shape, lambda i: (0, 0))

    out = pl.pallas_call(
        g_kernel,
        out_shape=jax.ShapeDtypeStruct((b_pad, D_OUT), jnp.float32),
        grid=(num_tiles,),
        in_specs=[
            pl.BlockSpec((tb, D_NOISE), lambda i: (i, 0)),   # x tile (pipelined)
            resident((D_NOISE, D_HIDDEN)),                   # w1 (VMEM-resident)
            resident((1, D_HIDDEN)),                         # b1
            resident((D_HIDDEN, D_HIDDEN)),                  # w2
            resident((1, D_HIDDEN)),                         # b2
            resident((D_HIDDEN, D_OUT)),                     # w3
            resident((1, D_OUT)),                            # b3
        ],
        out_specs=pl.BlockSpec((tb, D_OUT), lambda i: (i, 0)),
        compiler_params=pltpu.CompilerParams(
            dimension_semantics=("parallel",),               # 2 TCs on v7x
        ),
    )(x_bf, w1, b1, w2, b2, w3, b3)

    return out[:B]


def init_params(key):
    """Deterministic init mimicking nn.Linear's U(-1/sqrt(fan_in), 1/sqrt(fan_in)).
    Weights stored pre-transposed to (in, out); biases as (1, out)."""
    def linear(key, fan_in, fan_out):
        kw, kb = jax.random.split(key)
        bound = 1.0 / jnp.sqrt(fan_in)
        w = jax.random.uniform(kw, (fan_in, fan_out), jnp.float32, -bound, bound)
        b = jax.random.uniform(kb, (1, fan_out), jnp.float32, -bound, bound)
        return w, b

    k1, k2, k3 = jax.random.split(key, 3)
    w1, b1 = linear(k1, D_NOISE, D_HIDDEN)
    w2, b2 = linear(k2, D_HIDDEN, D_HIDDEN)
    w3, b3 = linear(k3, D_HIDDEN, D_OUT)
    return {"w1": w1, "b1": b1, "w2": w2, "b2": b2, "w3": w3, "b3": b3}


def reference_forward(x, p):
    """Mirrors the kernel's bf16-matmul / f32-accumulate path for tight comparison."""
    bf = jnp.bfloat16
    h = jnp.dot(x.astype(bf), p["w1"].astype(bf),
                preferred_element_type=jnp.float32)
    h = jnp.maximum(h + p["b1"], 0.0)
    h = jnp.dot(h.astype(bf), p["w2"].astype(bf),
                preferred_element_type=jnp.float32)
    h = jnp.maximum(h + p["b2"], 0.0)
    h = jnp.dot(h.astype(bf), p["w3"].astype(bf),
                preferred_element_type=jnp.float32)
    return jnp.tanh(h + p["b3"])


if __name__ == "__main__":
    key = jax.random.PRNGKey(0)
    kp, kx = jax.random.split(key)
    params = init_params(kp)

    # Small demo batch; not a multiple of the tile -> exercises pad + 2-step grid.
    B = 200
    x = jax.random.normal(kx, (B, D_NOISE), dtype=jnp.float32)

    out = generator_forward(x, params, tb=128)
    out = jax.block_until_ready(out)

    ref = reference_forward(x, params)
    assert out.shape == (B, D_OUT)
    assert jnp.allclose(out, ref, atol=2e-2, rtol=0), float(jnp.max(jnp.abs(out - ref)))

    print("KERNEL_OK")
</pallas_src>

<mosaic_0001>
module attributes {stable_mosaic.version = 11 : i64} {
  func.func @g_kernel(%arg0: i32, %arg1: memref<128x100xbf16, #tpu.memory_space<vmem>>, %arg2: memref<100x256xbf16, #tpu.memory_space<vmem>>, %arg3: memref<1x256xf32, #tpu.memory_space<vmem>>, %arg4: memref<256x256xbf16, #tpu.memory_space<vmem>>, %arg5: memref<1x256xf32, #tpu.memory_space<vmem>>, %arg6: memref<256x784xbf16, #tpu.memory_space<vmem>>, %arg7: memref<1x784xf32, #tpu.memory_space<vmem>>, %arg8: memref<128x784xf32, #tpu.memory_space<vmem>>) attributes {dimension_semantics = [#tpu.dimension_semantics<parallel>], iteration_bounds = array<i64: 2>, scalar_prefetch = 0 : i64, scratch_operands = 0 : i64, tpu.core_type = #tpu.core_type<tc>, window_params = [{transform_indices = @transform_0, window_bounds = array<i64: 128, 100>}, {pipeline_mode = #tpu.pipeline_mode<synchronous>, transform_indices = @transform_1, window_bounds = array<i64: 100, 256>}, {pipeline_mode = #tpu.pipeline_mode<synchronous>, transform_indices = @transform_2, window_bounds = array<i64: 1, 256>}, {pipeline_mode = #tpu.pipeline_mode<synchronous>, transform_indices = @transform_3, window_bounds = array<i64: 256, 256>}, {pipeline_mode = #tpu.pipeline_mode<synchronous>, transform_indices = @transform_4, window_bounds = array<i64: 1, 256>}, {pipeline_mode = #tpu.pipeline_mode<synchronous>, transform_indices = @transform_5, window_bounds = array<i64: 256, 784>}, {pipeline_mode = #tpu.pipeline_mode<synchronous>, transform_indices = @transform_6, window_bounds = array<i64: 1, 784>}, {transform_indices = @transform_7, window_bounds = array<i64: 128, 784>}]} {
    %c0 = arith.constant 0 : index
    %c0_0 = arith.constant 0 : index
    %0 = vector.load %arg1[%c0, %c0_0] : memref<128x100xbf16, #tpu.memory_space<vmem>>, vector<128x100xbf16>
    %c0_1 = arith.constant 0 : index
    %c0_2 = arith.constant 0 : index
    %1 = vector.load %arg2[%c0_1, %c0_2] : memref<100x256xbf16, #tpu.memory_space<vmem>>, vector<100x256xbf16>
    %cst = arith.constant dense<0.000000e+00> : vector<128x256xf32>
    %2 = tpu.matmul %0, %1, %cst {dimension_numbers = #tpu.dot_dimension_numbers<[1], [0], [0], [1], [0, 0, 1, 1], [], []>} : vector<128x100xbf16>, vector<100x256xbf16>, vector<128x256xf32> -> vector<128x256xf32>
    %c0_3 = arith.constant 0 : index
    %c0_4 = arith.constant 0 : index
    %3 = vector.load %arg3[%c0_3, %c0_4] : memref<1x256xf32, #tpu.memory_space<vmem>>, vector<1x256xf32>
    %4 = vector.broadcast %3 : vector<1x256xf32> to vector<128x256xf32>
    %5 = arith.addf %2, %4 : vector<128x256xf32>
    %cst_5 = arith.constant 0.000000e+00 : f32
    %6 = vector.broadcast %cst_5 : f32 to vector<128x256xf32>
    %7 = arith.maximumf %5, %6 : vector<128x256xf32>
    %8 = arith.truncf %7 : vector<128x256xf32> to vector<128x256xbf16>
    %c0_6 = arith.constant 0 : index
    %c0_7 = arith.constant 0 : index
    %9 = vector.load %arg4[%c0_6, %c0_7] : memref<256x256xbf16, #tpu.memory_space<vmem>>, vector<256x256xbf16>
    %cst_8 = arith.constant dense<0.000000e+00> : vector<128x256xf32>
    %10 = tpu.matmul %8, %9, %cst_8 {dimension_numbers = #tpu.dot_dimension_numbers<[1], [0], [0], [1], [0, 0, 1, 1], [], []>} : vector<128x256xbf16>, vector<256x256xbf16>, vector<128x256xf32> -> vector<128x256xf32>
    %c0_9 = arith.constant 0 : index
    %c0_10 = arith.constant 0 : index
    %11 = vector.load %arg5[%c0_9, %c0_10] : memref<1x256xf32, #tpu.memory_space<vmem>>, vector<1x256xf32>
    %12 = vector.broadcast %11 : vector<1x256xf32> to vector<128x256xf32>
    %13 = arith.addf %10, %12 : vector<128x256xf32>
    %cst_11 = arith.constant 0.000000e+00 : f32
    %14 = vector.broadcast %cst_11 : f32 to vector<128x256xf32>
    %15 = arith.maximumf %13, %14 : vector<128x256xf32>
    %16 = arith.truncf %15 : vector<128x256xf32> to vector<128x256xbf16>
    %c0_12 = arith.constant 0 : index
    %c0_13 = arith.constant 0 : index
    %17 = vector.load %arg6[%c0_12, %c0_13] : memref<256x784xbf16, #tpu.memory_space<vmem>>, vector<256x784xbf16>
    %cst_14 = arith.constant dense<0.000000e+00> : vector<128x784xf32>
    %18 = tpu.matmul %16, %17, %cst_14 {dimension_numbers = #tpu.dot_dimension_numbers<[1], [0], [0], [1], [0, 0, 1, 1], [], []>} : vector<128x256xbf16>, vector<256x784xbf16>, vector<128x784xf32> -> vector<128x784xf32>
    %c0_15 = arith.constant 0 : index
    %c0_16 = arith.constant 0 : index
    %19 = vector.load %arg7[%c0_15, %c0_16] : memref<1x784xf32, #tpu.memory_space<vmem>>, vector<1x784xf32>
    %20 = vector.broadcast %19 : vector<1x784xf32> to vector<128x784xf32>
    %21 = arith.addf %18, %20 : vector<128x784xf32>
    %22 = math.tanh %21 : vector<128x784xf32>
    %c0_17 = arith.constant 0 : index
    %c0_18 = arith.constant 0 : index
    %23 = vector.load %arg8[%c0_17, %c0_18] : memref<128x784xf32, #tpu.memory_space<vmem>>, vector<128x784xf32>
    tpu.vector_store %arg8[%c0_17, %c0_18], %22 {strides = array<i32>} : memref<128x784xf32, #tpu.memory_space<vmem>>, vector<128x784xf32>,
    return
  }
  func.func @transform_0(%arg0: i32) -> (i32, i32) {
    %c0_i32 = arith.constant 0 : i32
    %c0_i32_0 = arith.constant 0 : i32
    return %arg0, %c0_i32 : i32, i32
  }
  func.func @transform_1(%arg0: i32) -> (i32, i32) {
    %c0_i32 = arith.constant 0 : i32
    %c0_i32_0 = arith.constant 0 : i32
    %c0_i32_1 = arith.constant 0 : i32
    return %c0_i32, %c0_i32_0 : i32, i32
  }
  func.func @transform_2(%arg0: i32) -> (i32, i32) {
    %c0_i32 = arith.constant 0 : i32
    %c0_i32_0 = arith.constant 0 : i32
    %c0_i32_1 = arith.constant 0 : i32
    return %c0_i32, %c0_i32_0 : i32, i32
  }
  func.func @transform_3(%arg0: i32) -> (i32, i32) {
    %c0_i32 = arith.constant 0 : i32
    %c0_i32_0 = arith.constant 0 : i32
    %c0_i32_1 = arith.constant 0 : i32
    return %c0_i32, %c0_i32_0 : i32, i32
  }
  func.func @transform_4(%arg0: i32) -> (i32, i32) {
    %c0_i32 = arith.constant 0 : i32
    %c0_i32_0 = arith.constant 0 : i32
    %c0_i32_1 = arith.constant 0 : i32
    return %c0_i32, %c0_i32_0 : i32, i32
  }
  func.func @transform_5(%arg0: i32) -> (i32, i32) {
    %c0_i32 = arith.constant 0 : i32
    %c0_i32_0 = arith.constant 0 : i32
    %c0_i32_1 = arith.constant 0 : i32
    return %c0_i32, %c0_i32_0 : i32, i32
  }
  func.func @transform_6(%arg0: i32) -> (i32, i32) {
    %c0_i32 = arith.constant 0 : i32
    %c0_i32_0 = arith.constant 0 : i32
    %c0_i32_1 = arith.constant 0 : i32
    return %c0_i32, %c0_i32_0 : i32, i32
  }
  func.func @transform_7(%arg0: i32) -> (i32, i32) {
    %c0_i32 = arith.constant 0 : i32
    %c0_i32_0 = arith.constant 0 : i32
    return %arg0, %c0_i32 : i32, i32
  }
}

</mosaic_0001>

<bundles_post_ra>
// kernel: generator_forward.1
= control target key start
LH: loop header
LB: loop body
LE: loop exit
PB: predicated region body
PF: predicated region fallthrough
CT: control target
= control target key end

     0   :  { %s3234_s24 = smov 0   ;;  %s4265_s0 = inlined_call_operand.vmem [shape: bf16[256,100], index: 0, kind: input, shape index: {}]   ;;  %s4266_s1 = inlined_call_operand.vmem [shape: bf16[100,256], index: 1, kind: input, shape index: {}]   ;;  %s4267_s2 = inlined_call_operand.vmem [shape: f32[1,256], index: 2, kind: input, shape index: {}]   ;;  %s4268_s3 = inlined_call_operand.vmem [shape: bf16[256,256], index: 3, kind: input, shape index: {}]   ;;  %s4269_s4 = inlined_call_operand.vmem [shape: f32[1,256], index: 4, kind: input, shape index: {}]   ;;  %s4270_s5 = inlined_call_operand.vmem [shape: bf16[256,784], index: 5, kind: input, shape index: {}]   ;;  %s4271_s6 = inlined_call_operand.vmem [shape: f32[1,784], index: 6, kind: input, shape index: {}]   ;;  %s4272_s7 = inlined_call_operand.vmem [shape: f32[256,784], index: 7, kind: output, shape index: {}]  }
   0x1 LB: > { %s2449_s25 = sadd.s32 4294967295, %s3191_s24   ;;  %p2453_p0 = scmp.ge.s32.totalorder %s3191_s24, 1  ;;  %s3191_s24 = sphi %s3234_s24, %s17_s24  }
   0x2   : > { %p238_p1 = scmp.lt.s32.totalorder %s3191_s24, 3 }
   0x4   : > { %p239_p2 = pnand %p2453_p0, %p238_p1 }
   0x5   : > { %v2725_v0 = vld [vmem:[%s4266_s1 + $0x4] ss:$8 sps:$4 sm:$0xff] (!%p239_p2)   ;;  %v2727_v1 = vld [vmem:[%s4266_s1] ss:$8 sps:$4 sm:$0xff] (!%p239_p2)   ;;  %v3193_v2 = vmov (!%p239_p2), 0   ;;  %s2454_s30 = sshll.u32 (!%p239_p2), %s2449_s25, 4 }
   0x6   : > { %242 = sbr.rel (%p239_p2) target bundleno = 845 (0x34d), region = 48  ;;  %495 = vmatprep.mubr.bf16.mxu0 (!%p239_p2), %v3193_v2  ;;  %463 = vmatprep.subr.bf16.mxu0 (!%p239_p2), %v2725_v0  ;;  %v2728_v3 = vld [vmem:[%s4266_s1 + $0x14] ss:$8 sps:$4 sm:$0xff] (!%p239_p2)   ;;  %p272_p3 = scmp.lt.s32.totalorder (!%p239_p2), %s2454_s30, 31  ;;  %v2730_v4 = vld [vmem:[%s4266_s1 + $0x10] ss:$8 sps:$4 sm:$0xff] (!%p239_p2)  }
   0x7   : > { %464 = vmatpush1.bf16.msra.mxu0 (!%p239_p2), %v2727_v1  ;;  %v2731_v5 = vld [vmem:[%s4266_s1 + $0x24] ss:$8 sps:$4 sm:$0xff] (!%p239_p2)   ;;  %v2733_v6 = vld [vmem:[%s4266_s1 + $0x20] ss:$8 sps:$4 sm:$0xff] (!%p239_p2)   ;;  %v2734_v7 = vld [vmem:[%s4266_s1 + $0x34] ss:$8 sps:$4 sm:$0xff] (!%p239_p2)  }
   0x8   : > { %465 = vmatprep.subr.bf16.mxu0 (!%p239_p2), %v2728_v3  ;;  %v2736_v8 = vld [vmem:[%s4266_s1 + $0x30] ss:$8 sps:$4 sm:$0xff] (!%p239_p2)   ;;  %v2737_v9 = vld [vmem:[%s4266_s1 + $0x44] ss:$8 sps:$4 sm:$0xff] (!%p239_p2)   ;;  %v2739_v10 = vld [vmem:[%s4266_s1 + $0x40] ss:$8 sps:$4 sm:$0xff] (!%p239_p2)  }
   0x9   : > { %v2740_v11 = vld [vmem:[%s4266_s1 + $0x54] ss:$8 sps:$4 sm:$0xff] (!%p239_p2)   ;;  %v313_v12 = vld [vmem:[%s4266_s1 + $0x60] sm:$0x33] (!%p239_p2)  ;;  %v2742_v16 = vld [vmem:[%s4266_s1 + $0x50] ss:$8 sps:$4 sm:$0xff] (!%p239_p2)  }
   0xa   : > { %v2753_v13 = vld [vmem:[%s4268_s3 + $0x4] ss:$8 sps:$4 sm:$0xff] (!%p239_p2)   ;;  %v2755_v14 = vld [vmem:[%s4268_s3] ss:$8 sps:$4 sm:$0xff] (!%p239_p2)   ;;  %v2756_v15 = vld [vmem:[%s4268_s3 + $0x14] ss:$8 sps:$4 sm:$0xff] (!%p239_p2)   ;;  %v2479_v17 = vcombine.high (!%p239_p2), %v313_v12, %v313_v12  ;;  %v2478_v18 = vcombine.low (!%p239_p2), %v313_v12, %v313_v12 }
   0xb   : > { %466 = vmatpush1.bf16.msra.mxu0 (!%p239_p2), %v2730_v4  ;;  %828 = vmatprep.subr.bf16.mxu1 (!%p239_p2), %v2753_v13  ;;  %v2758_v19 = vld [vmem:[%s4268_s3 + $0x10] ss:$8 sps:$4 sm:$0xff] (!%p239_p2)   ;;  %vm456_vm0 = vcmask (!%p239_p2), 1041408   ;;  %v2759_v20 = vld [vmem:[%s4268_s3 + $0x24] ss:$8 sps:$4 sm:$0xff] (!%p239_p2)   ;;  %vm431_vm1 = vcmask (!%p239_p2), 818176  }
   0xc   : > { %467 = vmatprep.subr.bf16.mxu0 (!%p239_p2), %v2731_v5  ;;  %829 = vmatpush1.bf16.msra.mxu1 (!%p239_p2), %v2755_v14  ;;  %v458_v21 = vsel (!%p239_p2), %vm456_vm0, %v2478_v18, 0  ;;  %v2761_v22 = vld [vmem:[%s4268_s3 + $0x20] ss:$8 sps:$4 sm:$0xff] (!%p239_p2)   ;;  %v2762_v23 = vld [vmem:[%s4268_s3 + $0x34] ss:$8 sps:$4 sm:$0xff] (!%p239_p2)   ;;  %vm2284_vm2 = vcmask (!%p239_p2), 130048  }
   0xd   : > { %s4274_s30 = smov (!%p272_p3, %s2454_s30), 31  ;;  %830 = vmatprep.subr.bf16.mxu1 %v2756_v15  ;;  %v2764_v25 = vld [vmem:[%s4268_s3 + $0x30] ss:$8 sps:$4 sm:$0xff]   ;;  %v2765_v26 = vld [vmem:[%s4268_s3 + $0x44] ss:$8 sps:$4 sm:$0xff]  }
   0xe   : > { %s2455_s14 = sshll.u32 %s4274_s30, 2  ;;  %v2767_v27 = vld [vmem:[%s4268_s3 + $0x40] ss:$8 sps:$4 sm:$0xff]   ;;  %v2768_v28 = vld [vmem:[%s4268_s3 + $0x54] ss:$8 sps:$4 sm:$0xff]   ;;  %s2715_s15 = smul.u32 56, %s4274_s30 }
   0xf   : > { %s3267_s19 = scalar_lea.vmem %s4265_s0, %s2455_s14  ;;  %468 = vmatpush1.bf16.msra.mxu0 %v2733_v6  ;;  %v2770_v30 = vld [vmem:[%s4268_s3 + $0x50] ss:$8 sps:$4 sm:$0xff]   ;;  %v2771_v31 = vld [vmem:[%s4268_s3 + $0x64] ss:$8 sps:$4 sm:$0xff]   ;;  %v2773_v32 = vld [vmem:[%s4268_s3 + $0x60] ss:$8 sps:$4 sm:$0xff]  }
  0x10   : > { %469 = vmatprep.subr.bf16.mxu0 %v2734_v7  ;;  %831 = vmatpush1.bf16.msra.mxu1 %v2758_v19  ;;  %v2745_v24 = vld [vmem:[%s3267_s19] sm:$0xff]   ;;  %v2746_v29 = vld [vmem:[%s3267_s19 + $0x8] sm:$0xff]   ;;  %v2774_v33 = vld [vmem:[%s4268_s3 + $0x74] ss:$8 sps:$4 sm:$0xff]   ;;  %v316_v19 = vlaneseq  ;;  %s4020_s17 = scalar_lea.vmem %s4272_s7, %s2715_s15 }
  0x11   : > { %832 = vmatprep.subr.bf16.mxu1 %v2759_v20  ;;  %v2747_v34 = vld [vmem:[%s3267_s19 + $0x10] sm:$0xff]   ;;  %v2777_v36 = vld [vmem:[%s4268_s3 + $0x84] ss:$8 sps:$4 sm:$0xff]   ;;  %v2779_v37 = vld [vmem:[%s4268_s3 + $0x80] ss:$8 sps:$4 sm:$0xff]  }
  0x12   : > { %v2776_v35 = vld [vmem:[%s4268_s3 + $0x70] ss:$8 sps:$4 sm:$0xff]   ;;  %v2780_v38 = vld [vmem:[%s4268_s3 + $0x94] ss:$8 sps:$4 sm:$0xff]   ;;  %v2783_v41 = vld [vmem:[%s4268_s3 + $0xa4] ss:$8 sps:$4 sm:$0xff]  }
  0x13   : > { %470 = vmatpush1.bf16.msra.mxu0 %v2736_v8  ;;  %v2748_v39 = vld [vmem:[%s3267_s19 + $0x18] sm:$0xff]   ;;  %v2785_v42 = vld [vmem:[%s4268_s3 + $0xa0] ss:$8 sps:$4 sm:$0xff]   ;;  %v2789_v46 = vld [vmem:[%s4268_s3 + $0xc4] ss:$8 sps:$4 sm:$0xff]  }
  0x14   : > { %471 = vmatprep.subr.bf16.mxu0 %v2737_v9  ;;  %833 = vmatpush1.bf16.msra.mxu1 %v2761_v22  ;;  %v2782_v40 = vld [vmem:[%s4268_s3 + $0x90] ss:$8 sps:$4 sm:$0xff]   ;;  %v2786_v43 = vld [vmem:[%s4268_s3 + $0xb4] ss:$8 sps:$4 sm:$0xff]   ;;  %v2749_v44 = vld [vmem:[%s3267_s19 + $0x20] sm:$0xff]   ;;  %v3493_v22 = vshrl.u32 %v316_v19, 7 }
  0x15   : > { %834 = vmatprep.subr.bf16.mxu1 %v2762_v23  ;;  %v2788_v45 = vld [vmem:[%s4268_s3 + $0xb0] ss:$8 sps:$4 sm:$0xff]   ;;  %v2791_v47 = vld [vmem:[%s4268_s3 + $0xc0] ss:$8 sps:$4 sm:$0xff]   ;;  %v2792_v48 = vld [vmem:[%s4268_s3 + $0xd4] ss:$8 sps:$4 sm:$0xff]  }
  0x16   : > { %v2750_v49 = vld [vmem:[%s3267_s19 + $0x28] sm:$0xff]   ;;  %v2751_v50 = vld [vmem:[%s3267_s19 + $0x30] sm:$0xff]   ;;  %v2752_v51 = vld [vmem:[%s3267_s19 + $0x38] sm:$0xff]  }
  0x17   : > { %472 = vmatpush1.bf16.msra.mxu0 %v2739_v10  ;;  %v2794_v52 = vld [vmem:[%s4268_s3 + $0xd0] ss:$8 sps:$4 sm:$0xff]   ;;  %v2795_v53 = vld [vmem:[%s4268_s3 + $0xe4] ss:$8 sps:$4 sm:$0xff]   ;;  %v2797_v54 = vld [vmem:[%s4268_s3 + $0xe0] ss:$8 sps:$4 sm:$0xff]  }
  0x18   : > { %473 = vmatprep.subr.bf16.mxu0 %v2740_v11  ;;  %835 = vmatpush1.bf16.msra.mxu1 %v2764_v25  ;;  %v2798_v55 = vld [vmem:[%s4268_s3 + $0xf4] ss:$8 sps:$4 sm:$0xff]   ;;  %v2800_v56 = vld [vmem:[%s4268_s3 + $0xf0] ss:$8 sps:$4 sm:$0xff]   ;;  %v2803_v58 = vld [vmem:[%s4270_s5 + $0x4] ss:$28 sps:$4 sm:$0xff]  }
  0x19   : > { %836 = vmatprep.subr.bf16.mxu1 %v2765_v26  ;;  %v2801_v57 = vld [vmem:[%s4270_s5] ss:$28 sps:$4 sm:$0xff]   ;;  %v2806_v59 = vld [vmem:[%s4270_s5 + $0xc] ss:$28 sps:$4 sm:$0xff]   ;;  %v2807_v61 = vld [vmem:[%s4270_s5 + $0x38] ss:$28 sps:$4 sm:$0xff]  }
  0x1a   : > { %v2809_v60 = vld [vmem:[%s4270_s5 + $0x3c] ss:$28 sps:$4 sm:$0xff]   ;;  %v2815_v62 = vld [vmem:[%s4270_s5 + $0x74] ss:$28 sps:$4 sm:$0xff]   ;;  %v2821_v0 = vld [vmem:[%s4270_s5 + $0xac] ss:$28 sps:$4 sm:$0xff]  }
  0x1b   : > { %474 = vmatpush1.bf16.msra.mxu0 %v2742_v16  ;;  %v2813_v63 = vld [vmem:[%s4270_s5 + $0x70] ss:$28 sps:$4 sm:$0xff]   ;;  %v2819_v1 = vld [vmem:[%s4270_s5 + $0xa8] ss:$28 sps:$4 sm:$0xff]   ;;  %v2825_v3 = vld [vmem:[%s4270_s5 + $0xe0] ss:$28 sps:$4 sm:$0xff]  }
  0x1c   : > { %2480 = vmatprep.subr.msk.bf16.mxu0 %vm456_vm0, %v2479_v17  ;;  %837 = vmatpush1.bf16.msra.mxu1 %v2767_v27  ;;  %v2833_v4 = vld [vmem:[%s4270_s5 + $0x11c] ss:$28 sps:$4 sm:$0xff]   ;;  %v2839_v6 = vld [vmem:[%s4270_s5 + $0x154] ss:$28 sps:$4 sm:$0xff]   ;;  %v2845_v8 = vld [vmem:[%s4270_s5 + $0x18c] ss:$28 sps:$4 sm:$0xff]  }
  0x1d   : > { %838 = vmatprep.subr.bf16.mxu1 %v2768_v28  ;;  %v2831_v5 = vld [vmem:[%s4270_s5 + $0x118] ss:$28 sps:$4 sm:$0xff]   ;;  %v2837_v7 = vld [vmem:[%s4270_s5 + $0x150] ss:$28 sps:$4 sm:$0xff]   ;;  %v2843_v9 = vld [vmem:[%s4270_s5 + $0x188] ss:$28 sps:$4 sm:$0xff]  }
  0x1e   : > { %v2851_v10 = vld [vmem:[%s4270_s5 + $0x1c4] ss:$28 sps:$4 sm:$0xff]   ;;  %v2857_v12 = vld [vmem:[%s4270_s5 + $0x1fc] ss:$28 sps:$4 sm:$0xff]   ;;  %v2863_v14 = vld [vmem:[%s4270_s5 + $0x234] ss:$28 sps:$4 sm:$0xff]  }
  0x1f   : > { %476 = vmatpush1.bf16.msra.mxu0 %v458_v21  ;;  %v2849_v11 = vld [vmem:[%s4270_s5 + $0x1c0] ss:$28 sps:$4 sm:$0xff]   ;;  %v2855_v13 = vld [vmem:[%s4270_s5 + $0x1f8] ss:$28 sps:$4 sm:$0xff]   ;;  %v2861_v15 = vld [vmem:[%s4270_s5 + $0x230] ss:$28 sps:$4 sm:$0xff]  }
  0x20   : > { %839 = vmatpush1.bf16.msra.mxu1 %v2770_v30  ;;  %1730 = vmatprep.subr.bf16.mxu0 %v2803_v58  ;;  %v2869_v16 = vld [vmem:[%s4270_s5 + $0x26c] ss:$28 sps:$4 sm:$0xff]   ;;  %v2875_v18 = vld [vmem:[%s4270_s5 + $0x2a4] ss:$28 sps:$4 sm:$0xff]   ;;  %v2881_v21 = vld [vmem:[%s4270_s5 + $0x2dc] ss:$28 sps:$4 sm:$0xff]  }
  0x21   : > { %840 = vmatprep.subr.bf16.mxu1 %v2771_v31  ;;  %v2867_v17 = vld [vmem:[%s4270_s5 + $0x268] ss:$28 sps:$4 sm:$0xff]   ;;  %v2873_v20 = vld [vmem:[%s4270_s5 + $0x2a0] ss:$28 sps:$4 sm:$0xff]   ;;  %v2879_v23 = vld [vmem:[%s4270_s5 + $0x2d8] ss:$28 sps:$4 sm:$0xff]  }
  0x22   : > { %2481 = vmatmul.mubr.msk.bf16.vlgmr.msra.gmra.mrb[0].mxu0 %vm431_vm1, %v2745_v24  ;;  %v3499_v24 = vsub.s32 0, %v3493_v22  ;;  %v314_v25 = vld [vmem:[%s4267_s2] sm:$0x3]  ;;  %v3505_v26 = vsub.s32 1, %v3493_v22 }
  0x23   : > { %505 = vmatprep.mubr.bf16.mxu0 %v3193_v2  ;;  %1731 = vmatpush1.bf16.msra.mxu0 %v2801_v57  ;;  %v2836_v19 = vld [vmem:[%s4270_s5 + $0x124] ss:$28 sps:$4 sm:$0xff]  }
  0x24   : > { %841 = vmatpush1.bf16.msra.mxu1 %v2773_v32  ;;  %1732 = vmatprep.subr.bf16.mxu0 %v2809_v60  ;;  %v3508_v27 = vrot.slane %v314_v25, %v3499_v24  ;;  %v3511_v28 = vrot.slane %v314_v25, %v3505_v26 }
  0x25   : > { %842 = vmatprep.subr.bf16.mxu1 %v2774_v33 }
  0x27   : > { %1733 = vmatpush1.bf16.msra.mxu0 %v2807_v61 }
  0x28   : > { %843 = vmatpush1.bf16.msra.mxu1 %v2776_v35  ;;  %1734 = vmatprep.subr.bf16.mxu0 %v2815_v62  ;;  %v2816_v62 = vld [vmem:[%s4270_s5 + $0x78] ss:$28 sps:$4 sm:$0xff]  }
  0x29   : > { %844 = vmatprep.subr.bf16.mxu1 %v2777_v36 }
  0x2a   : > { %2482 = vmatmul.mubr.msk.bf16.gmra.mrb[4].mxu0 %vm431_vm1, %v2746_v29 }
  0x2b   : > { %515 = vmatprep.mubr.bf16.mxu0 %v3193_v2  ;;  %1735 = vmatpush1.bf16.msra.mxu0 %v2813_v63 }
  0x2c   : > { %845 = vmatpush1.bf16.msra.mxu1 %v2779_v37  ;;  %1736 = vmatprep.subr.bf16.mxu0 %v2821_v0 }
  0x2d   : > { %846 = vmatprep.subr.bf16.mxu1 %v2780_v38 }
  0x2f   : > { %1737 = vmatpush1.bf16.msra.mxu0 %v2819_v1  ;;  %v2824_v1 = vld [vmem:[%s4270_s5 + $0xb4] ss:$28 sps:$4 sm:$0xff]  }
  0x30   : > { %847 = vmatpush1.bf16.msra.mxu1 %v2782_v40 }
  0x31   : > { %848 = vmatprep.subr.bf16.mxu1 %v2783_v41 }
  0x32   : > { %2483 = vmatmul.mubr.msk.bf16.gmra.mrb[8].mxu0 %vm431_vm1, %v2747_v34 }
  0x33   : > { %525 = vmatprep.mubr.bf16.mxu0 %v3193_v2 }
  0x34   : > { %849 = vmatpush1.bf16.msra.mxu1 %v2785_v42 }
  0x35   : > { %850 = vmatprep.subr.bf16.mxu1 %v2786_v43 }
  0x38   : > { %851 = vmatpush1.bf16.msra.mxu1 %v2788_v45 }
  0x39   : > { %852 = vmatprep.subr.bf16.mxu1 %v2789_v46 }
  0x3a   : > { %2484 = vmatmul.mubr.msk.bf16.gmra.mrb[12].mxu0 %vm431_vm1, %v2748_v39 }
  0x3b   : > { %535 = vmatprep.mubr.bf16.mxu0 %v3193_v2 }
  0x3c   : > { %853 = vmatpush1.bf16.msra.mxu1 %v2791_v47  ;;  %v2812_v47 = vld [vmem:[%s4270_s5 + $0x44] ss:$28 sps:$4 sm:$0xff]  }
  0x3d   : > { %854 = vmatprep.subr.bf16.mxu1 %v2792_v48 }
  0x40   : > { %855 = vmatpush1.bf16.msra.mxu1 %v2794_v52 }
  0x41   : > { %856 = vmatprep.subr.bf16.mxu1 %v2795_v53  ;;  %v2810_v53 = vld [vmem:[%s4270_s5 + $0x40] ss:$28 sps:$4 sm:$0xff]  }
  0x42   : > { %2485 = vmatmul.mubr.msk.bf16.gmra.mrb[16].mxu0 %vm431_vm1, %v2749_v44  ;;  %v2804_v44 = vld [vmem:[%s4270_s5 + $0x8] ss:$28 sps:$4 sm:$0xff]  }
  0x43   : > { %545 = vmatprep.mubr.bf16.mxu0 %v3193_v2 }
  0x44   : > { %857 = vmatpush1.bf16.msra.mxu1 %v2797_v54 }
  0x45   : > { %858 = vmatprep.subr.bf16.mxu1 %v2798_v55 }
  0x48   : > { %859 = vmatpush1.bf16.msra.mxu1 %v2800_v56  ;;  %v2818_v56 = vld [vmem:[%s4270_s5 + $0x7c] ss:$28 sps:$4 sm:$0xff]  }
  0x49   : > { %1843 = vmatprep.subr.bf16.mxu1 %v2806_v59 }
  0x4a   : > { %2486 = vmatmul.mubr.msk.bf16.gmra.mrb[20].mxu0 %vm431_vm1, %v2750_v49 }
  0x4b   : > { %555 = vmatprep.mubr.bf16.mxu0 %v3193_v2 }
  0x52   : > { %2487 = vmatmul.mubr.msk.bf16.gmra.mrb[24].mxu0 %vm431_vm1, %v2751_v50 }
  0x53   : > { %565 = vmatprep.mubr.bf16.mxu0 %v3193_v2  ;;  %v2827_v2 = vld [vmem:[%s4270_s5 + $0xe4] ss:$28 sps:$4 sm:$0xff]  }
  0x54   : > { %1738 = vmatprep.subr.bf16.mxu0 %v2827_v2 }
  0x55   : > { %1739 = vmatpush1.bf16.msra.mxu0 %v2825_v3 }
  0x56   : > { %1740 = vmatprep.subr.bf16.mxu0 %v2833_v4 }
  0x59   : > { %1741 = vmatpush1.bf16.msra.mxu0 %v2831_v5 }
  0x5a   : > { %2488 = vmatmul.mubr.msk.bf16.gmra.mrb[28].mxu0 %vm431_vm1, %v2752_v51  ;;  %1742 = vmatprep.subr.bf16.mxu0 %v2839_v6 }
  0x5d   : > { %1743 = vmatpush1.bf16.msra.mxu0 %v2837_v7  ;;  %v2822_v7 = vld [vmem:[%s4270_s5 + $0xb0] ss:$28 sps:$4 sm:$0xff]  }
  0x5e   : > { %1744 = vmatprep.subr.bf16.mxu0 %v2845_v8 }
  0x61   : > { %1745 = vmatpush1.bf16.msra.mxu0 %v2843_v9 }
  0x62   : > { %1746 = vmatprep.subr.bf16.mxu0 %v2851_v10  ;;  %v2830_v10 = vld [vmem:[%s4270_s5 + $0xec] ss:$28 sps:$4 sm:$0xff]  }
  0x65   : > { %1747 = vmatpush1.bf16.msra.mxu0 %v2849_v11 }
  0x66   : > { %1748 = vmatprep.subr.bf16.mxu0 %v2857_v12 }
  0x69   : > { %1749 = vmatpush1.bf16.msra.mxu0 %v2855_v13 }
  0x6a   : > { %1750 = vmatprep.subr.bf16.mxu0 %v2863_v14 }
  0x6d   : > { %1751 = vmatpush1.bf16.msra.mxu0 %v2861_v15 }
  0x6e   : > { %1752 = vmatprep.subr.bf16.mxu0 %v2869_v16  ;;  %v2828_v16 = vld [vmem:[%s4270_s5 + $0xe8] ss:$28 sps:$4 sm:$0xff]  }
  0x71   : > { %1753 = vmatpush1.bf16.msra.mxu0 %v2867_v17 }
  0x72   : > { %1754 = vmatprep.subr.bf16.mxu0 %v2875_v18 }
  0x75   : > { %1755 = vmatpush1.bf16.msra.mxu0 %v2873_v20 }
  0x76   : > { %1756 = vmatprep.subr.bf16.mxu0 %v2881_v21 }
  0x79   : > { %1757 = vmatpush1.bf16.msra.mxu0 %v2879_v23 }
  0xf5   : > { %v497_v29 = vpop.f32.mrb[0].mxu0 }
  0xf6   : > { %v498_v30 = vadd.f32 %v497_v29, %v3508_v27  ;;  %v499_v31 = vpop.f32.mrb[1].mxu0 }
  0xf7   : > { %v500_v32 = vadd.f32 %v499_v31, %v3511_v28  ;;  %v501_v33 = vpop.f32.mrb[2].mxu0 }
  0xf8   : > { %v502_v34 = vadd.f32 %v501_v33, %v3508_v27  ;;  %v503_v35 = vpop.f32.mrb[3].mxu0  ;;  %v576_v37 = vmax.f32 %v498_v30, 0.0  ;;  %v2834_v30 = vld [vmem:[%s4270_s5 + $0x120] ss:$28 sps:$4 sm:$0xff]  }
  0xf9   : > { %v504_v36 = vadd.f32 %v503_v35, %v3511_v28  ;;  %v577_v39 = vmax.f32 %v500_v32, 0.0  ;;  %v2842_v33 = vld [vmem:[%s4270_s5 + $0x15c] ss:$28 sps:$4 sm:$0xff]  }
  0xfa   : > { %v578_v38 = vmax.f32 %v502_v34, 0.0 }
  0xfb   : > { %v579_v40 = vmax.f32 %v504_v36, 0.0 }
  0xfc   : > { %v608_v41 = vpack.c.bf16 %v578_v38, %v576_v37 }
  0xfd   : > { %v507_v42 = vpop.f32.mrb[4].mxu0  ;;  %v609_v43 = vpack.c.bf16 %v579_v40, %v577_v39  ;;  %v2840_v39 = vld [vmem:[%s4270_s5 + $0x158] ss:$28 sps:$4 sm:$0xff]  }
  0xfe   : > { %v508_v45 = vadd.f32 %v507_v42, %v3508_v27  ;;  %v509_v46 = vpop.f32.mrb[5].mxu0  ;;  %v2848_v42 = vld [vmem:[%s4270_s5 + $0x194] ss:$28 sps:$4 sm:$0xff]  }
  0xff   : > { %v510_v48 = vadd.f32 %v509_v46, %v3511_v28  ;;  %v511_v49 = vpop.f32.mrb[6].mxu0  ;;  %860 = vmatprep.mubr.bf16.mxu1 %v609_v43 }
 0x100   : > { %v512_v50 = vadd.f32 %v511_v49, %v3508_v27  ;;  %v513_v51 = vpop.f32.mrb[7].mxu0  ;;  %861 = vmatmul.mubr.bf16.vlgmr.msra.gmra.mrb[0].mxu1 %v608_v41  ;;  %v580_v54 = vmax.f32 %v508_v45, 0.0 }
 0x101   : > { %v514_v52 = vadd.f32 %v513_v51, %v3511_v28  ;;  %1844 = vmatpush1.bf16.msra.mxu1 %v2804_v44  ;;  %v581_v57 = vmax.f32 %v510_v48, 0.0  ;;  %v2846_v48 = vld [vmem:[%s4270_s5 + $0x190] ss:$28 sps:$4 sm:$0xff]  }
 0x102   : > { %v582_v55 = vmax.f32 %v512_v50, 0.0  ;;  %1845 = vmatprep.subr.bf16.mxu1 %v2812_v47  ;;  %v2854_v51 = vld [vmem:[%s4270_s5 + $0x1cc] ss:$28 sps:$4 sm:$0xff]  }
 0x103   : > { %v583_v58 = vmax.f32 %v514_v52, 0.0 }
 0x104   : > { %v610_v59 = vpack.c.bf16 %v582_v55, %v580_v54 }
 0x105   : > { %v611_v60 = vpack.c.bf16 %v583_v58, %v581_v57  ;;  %v517_v61 = vpop.f32.mrb[8].mxu0  ;;  %1846 = vmatpush1.bf16.msra.mxu1 %v2810_v53  ;;  %v2852_v57 = vld [vmem:[%s4270_s5 + $0x1c8] ss:$28 sps:$4 sm:$0xff]  }
 0x106   : > { %v518_v63 = vadd.f32 %v517_v61, %v3508_v27  ;;  %v519_v0 = vpop.f32.mrb[9].mxu0  ;;  %1847 = vmatprep.subr.bf16.mxu1 %v2818_v56 }
 0x107   : > { %v520_v2 = vadd.f32 %v519_v0, %v3511_v28  ;;  %v521_v3 = vpop.f32.mrb[10].mxu0  ;;  %870 = vmatprep.mubr.bf16.mxu1 %v611_v60  ;;  %v2860_v60 = vld [vmem:[%s4270_s5 + $0x204] ss:$28 sps:$4 sm:$0xff]  }
 0x108   : > { %v522_v4 = vadd.f32 %v521_v3, %v3508_v27  ;;  %v523_v5 = vpop.f32.mrb[11].mxu0  ;;  %871 = vmatmul.mubr.bf16.gmra.mrb[4].mxu1 %v610_v59  ;;  %v584_v8 = vmax.f32 %v518_v63, 0.0 }
 0x109   : > { %v524_v6 = vadd.f32 %v523_v5, %v3511_v28  ;;  %1848 = vmatpush1.bf16.msra.mxu1 %v2816_v62  ;;  %v585_v11 = vmax.f32 %v520_v2, 0.0  ;;  %v2858_v2 = vld [vmem:[%s4270_s5 + $0x200] ss:$28 sps:$4 sm:$0xff]  }
 0x10a   : > { %v586_v9 = vmax.f32 %v522_v4, 0.0  ;;  %1849 = vmatprep.subr.bf16.mxu1 %v2824_v1  ;;  %v2866_v5 = vld [vmem:[%s4270_s5 + $0x23c] ss:$28 sps:$4 sm:$0xff]  }
 0x10b   : > { %v587_v12 = vmax.f32 %v524_v6, 0.0 }
 0x10c   : > { %v612_v13 = vpack.c.bf16 %v586_v9, %v584_v8 }
 0x10d   : > { %v613_v14 = vpack.c.bf16 %v587_v12, %v585_v11  ;;  %v527_v15 = vpop.f32.mrb[12].mxu0  ;;  %1850 = vmatpush1.bf16.msra.mxu1 %v2822_v7  ;;  %v2864_v11 = vld [vmem:[%s4270_s5 + $0x238] ss:$28 sps:$4 sm:$0xff]  }
 0x10e   : > { %v528_v17 = vadd.f32 %v527_v15, %v3508_v27  ;;  %v529_v18 = vpop.f32.mrb[13].mxu0  ;;  %1851 = vmatprep.subr.bf16.mxu1 %v2830_v10 }
 0x10f   : > { %v530_v20 = vadd.f32 %v529_v18, %v3511_v28  ;;  %v531_v21 = vpop.f32.mrb[14].mxu0  ;;  %880 = vmatprep.mubr.bf16.mxu1 %v613_v14  ;;  %v2872_v14 = vld [vmem:[%s4270_s5 + $0x274] ss:$28 sps:$4 sm:$0xff]  }
 0x110   : > { %v532_v23 = vadd.f32 %v531_v21, %v3508_v27  ;;  %v533_v25 = vpop.f32.mrb[15].mxu0  ;;  %881 = vmatmul.mubr.bf16.gmra.mrb[8].mxu1 %v612_v13  ;;  %v588_v31 = vmax.f32 %v528_v17, 0.0 }
 0x111   : > { %v534_v29 = vadd.f32 %v533_v25, %v3511_v28  ;;  %1852 = vmatpush1.bf16.msra.mxu1 %v2828_v16  ;;  %v589_v34 = vmax.f32 %v530_v20, 0.0  ;;  %v2870_v20 = vld [vmem:[%s4270_s5 + $0x270] ss:$28 sps:$4 sm:$0xff]  }
 0x112   : > { %v590_v32 = vmax.f32 %v532_v23, 0.0  ;;  %1853 = vmatprep.subr.bf16.mxu1 %v2836_v19  ;;  %v2878_v25 = vld [vmem:[%s4270_s5 + $0x2ac] ss:$28 sps:$4 sm:$0xff]  }
 0x113   : > { %v591_v35 = vmax.f32 %v534_v29, 0.0 }
 0x114   : > { %v614_v36 = vpack.c.bf16 %v590_v32, %v588_v31 }
 0x115   : > { %v615_v37 = vpack.c.bf16 %v591_v35, %v589_v34  ;;  %v537_v38 = vpop.f32.mrb[16].mxu0  ;;  %1854 = vmatpush1.bf16.msra.mxu1 %v2834_v30  ;;  %v2876_v34 = vld [vmem:[%s4270_s5 + $0x2a8] ss:$28 sps:$4 sm:$0xff]  }
 0x116   : > { %v538_v40 = vadd.f32 %v537_v38, %v3508_v27  ;;  %v539_v41 = vpop.f32.mrb[17].mxu0  ;;  %1855 = vmatprep.subr.bf16.mxu1 %v2842_v33 }
 0x117   : > { %v540_v43 = vadd.f32 %v539_v41, %v3511_v28  ;;  %v541_v44 = vpop.f32.mrb[18].mxu0  ;;  %890 = vmatprep.mubr.bf16.mxu1 %v615_v37  ;;  %v2884_v37 = vld [vmem:[%s4270_s5 + $0x2e4] ss:$28 sps:$4 sm:$0xff]  }
 0x118   : > { %v542_v45 = vadd.f32 %v541_v44, %v3508_v27  ;;  %v543_v46 = vpop.f32.mrb[19].mxu0  ;;  %891 = vmatmul.mubr.bf16.gmra.mrb[12].mxu1 %v614_v36  ;;  %v592_v49 = vmax.f32 %v538_v40, 0.0 }
 0x119   : > { %v544_v47 = vadd.f32 %v543_v46, %v3511_v28  ;;  %1856 = vmatpush1.bf16.msra.mxu1 %v2840_v39  ;;  %v593_v52 = vmax.f32 %v540_v43, 0.0  ;;  %v2882_v43 = vld [vmem:[%s4270_s5 + $0x2e0] ss:$28 sps:$4 sm:$0xff]  }
 0x11a   : > { %v594_v50 = vmax.f32 %v542_v45, 0.0  ;;  %1857 = vmatprep.subr.bf16.mxu1 %v2848_v42 }
 0x11b   : > { %v595_v53 = vmax.f32 %v544_v47, 0.0 }
 0x11c   : > { %v616_v54 = vpack.c.bf16 %v594_v50, %v592_v49  ;;  %v2885_v50 = vld [vmem:[%s4270_s5 + $0x310] ss:$28 sps:$4 sm:$0xff]  }
 0x11d   : > { %v617_v55 = vpack.c.bf16 %v595_v53, %v593_v52  ;;  %v547_v56 = vpop.f32.mrb[20].mxu0  ;;  %1858 = vmatpush1.bf16.msra.mxu1 %v2846_v48  ;;  %v2893_v52 = vld [vmem:[%s4270_s5 + $0x34c] ss:$28 sps:$4 sm:$0xff]   ;;  %v2896_v53 = vld [vmem:[%s4270_s5 + $0x354] ss:$28 sps:$4 sm:$0xff]  }
 0x11e   : > { %v548_v58 = vadd.f32 %v547_v56, %v3508_v27  ;;  %v549_v59 = vpop.f32.mrb[21].mxu0  ;;  %1859 = vmatprep.subr.bf16.mxu1 %v2854_v51  ;;  %v2888_v51 = vld [vmem:[%s4270_s5 + $0x318] ss:$28 sps:$4 sm:$0xff]  }
 0x11f   : > { %v550_v61 = vadd.f32 %v549_v59, %v3511_v28  ;;  %v551_v62 = vpop.f32.mrb[22].mxu0  ;;  %900 = vmatprep.mubr.bf16.mxu1 %v617_v55  ;;  %v2894_v55 = vld [vmem:[%s4270_s5 + $0x350] ss:$28 sps:$4 sm:$0xff]  }
 0x120   : > { %v552_v63 = vadd.f32 %v551_v62, %v3508_v27  ;;  %v553_v0 = vpop.f32.mrb[23].mxu0  ;;  %901 = vmatmul.mubr.bf16.gmra.mrb[16].mxu1 %v616_v54  ;;  %v596_v3 = vmax.f32 %v548_v58, 0.0  ;;  %v2891_v54 = vld [vmem:[%s4270_s5 + $0x348] ss:$28 sps:$4 sm:$0xff]   ;;  %v2899_v56 = vld [vmem:[%s4270_s5 + $0x14] ss:$28 sps:$4 sm:$0xff]  }
 0x121   : > { %v554_v1 = vadd.f32 %v553_v0, %v3511_v28  ;;  %1860 = vmatpush1.bf16.msra.mxu1 %v2852_v57  ;;  %v597_v6 = vmax.f32 %v550_v61, 0.0  ;;  %v3656_v57 = vld [vmem:[%s4270_s5 + $0x1d8] ss:$28 sps:$4 sm:$0xff]   ;;  %v656_v58 = vld [vmem:[%s4269_s4] sm:$0x3] }
 0x122   : > { %v598_v4 = vmax.f32 %v552_v63, 0.0  ;;  %1861 = vmatprep.subr.bf16.mxu1 %v2860_v60  ;;  %v3663_v59 = vrot.slane %v656_v58, %v3499_v24  ;;  %v3666_v60 = vrot.slane %v656_v58, %v3505_v26 }
 0x123   : > { %v599_v7 = vmax.f32 %v554_v1, 0.0 }
 0x124   : > { %v618_v8 = vpack.c.bf16 %v598_v4, %v596_v3 }
 0x125   : > { %v619_v9 = vpack.c.bf16 %v599_v7, %v597_v6  ;;  %v557_v10 = vpop.f32.mrb[24].mxu0  ;;  %1862 = vmatpush1.bf16.msra.mxu1 %v2858_v2 }
 0x126   : > { %v558_v12 = vadd.f32 %v557_v10, %v3508_v27  ;;  %v559_v13 = vpop.f32.mrb[25].mxu0  ;;  %1863 = vmatprep.subr.bf16.mxu1 %v2866_v5 }
 0x127   : > { %v560_v15 = vadd.f32 %v559_v13, %v3511_v28  ;;  %v561_v16 = vpop.f32.mrb[26].mxu0  ;;  %910 = vmatprep.mubr.bf16.mxu1 %v619_v9  ;;  %v3682_v13 = vld [vmem:[%s4270_s5 + $0x18] ss:$28 sps:$4 sm:$0xff]  }
 0x128   : > { %v562_v17 = vadd.f32 %v561_v16, %v3508_v27  ;;  %v563_v18 = vpop.f32.mrb[27].mxu0  ;;  %911 = vmatmul.mubr.bf16.gmra.mrb[20].mxu1 %v618_v8  ;;  %v600_v21 = vmax.f32 %v558_v12, 0.0  ;;  %v2897_v12 = vld [vmem:[%s4270_s5 + $0x10] ss:$28 sps:$4 sm:$0xff]  }
 0x129   : > { %v564_v19 = vadd.f32 %v563_v18, %v3511_v28  ;;  %1864 = vmatpush1.bf16.msra.mxu1 %v2864_v11  ;;  %v601_v29 = vmax.f32 %v560_v15, 0.0  ;;  %v2902_v16 = vld [vmem:[%s4270_s5 + $0x4c] ss:$28 sps:$4 sm:$0xff]  }
 0x12a   : > { %v602_v23 = vmax.f32 %v562_v17, 0.0  ;;  %1865 = vmatprep.subr.bf16.mxu1 %v2872_v14  ;;  %v3691_v17 = vld [vmem:[%s4270_s5 + $0x210] ss:$28 sps:$4 sm:$0xff]  }
 0x12b   : > { %v603_v30 = vmax.f32 %v564_v19, 0.0 }
 0x12c   : > { %v620_v31 = vpack.c.bf16 %v602_v23, %v600_v21 }
 0x12d   : > { %v621_v32 = vpack.c.bf16 %v603_v30, %v601_v29  ;;  %v567_v33 = vpop.f32.mrb[28].mxu0  ;;  %1866 = vmatpush1.bf16.msra.mxu1 %v2870_v20  ;;  %v3707_v29 = vld [vmem:[%s4270_s5 + $0x50] ss:$28 sps:$4 sm:$0xff]  }
 0x12e   : > { %v568_v35 = vadd.f32 %v567_v33, %v3508_v27  ;;  %v569_v36 = vpop.f32.mrb[29].mxu0  ;;  %1867 = vmatprep.subr.bf16.mxu1 %v2878_v25  ;;  %v2900_v25 = vld [vmem:[%s4270_s5 + $0x48] ss:$28 sps:$4 sm:$0xff]  }
 0x12f   : > { %v570_v38 = vadd.f32 %v569_v36, %v3511_v28  ;;  %v571_v39 = vpop.f32.mrb[30].mxu0  ;;  %920 = vmatprep.mubr.bf16.mxu1 %v621_v32  ;;  %v2905_v32 = vld [vmem:[%s4270_s5 + $0x84] ss:$28 sps:$4 sm:$0xff]  }
 0x130   : > { %v572_v40 = vadd.f32 %v571_v39, %v3508_v27  ;;  %v573_v41 = vpop.f32.mrb[31].mxu0  ;;  %921 = vmatmul.mubr.bf16.gmra.mrb[24].mxu1 %v620_v31  ;;  %v604_v44 = vmax.f32 %v568_v35, 0.0  ;;  %v2887_v27 = vld [vmem:[%s4270_s5 + $0x314] ss:$28 sps:$4 sm:$0xff]   ;;  %v3716_v33 = vld [vmem:[%s4270_s5 + $0x248] ss:$28 sps:$4 sm:$0xff]  }
 0x131   : > { %v574_v42 = vadd.f32 %v573_v41, %v3511_v28  ;;  %1868 = vmatpush1.bf16.msra.mxu1 %v2876_v34  ;;  %v605_v46 = vmax.f32 %v570_v38, 0.0  ;;  %v2890_v28 = vld [vmem:[%s4270_s5 + $0x31c] ss:$28 sps:$4 sm:$0xff]   ;;  %1758 = vmatprep.subr.bf16.mxu0 %v2887_v27 }
 0x132   : > { %v606_v45 = vmax.f32 %v572_v40, 0.0  ;;  %1869 = vmatprep.subr.bf16.mxu1 %v2884_v37  ;;  %1759 = vmatpush1.bf16.msra.mxu0 %v2885_v50  ;;  %v2903_v39 = vld [vmem:[%s4270_s5 + $0x80] ss:$28 sps:$4 sm:$0xff]   ;;  %v3729_v40 = vld [vmem:[%s4270_s5 + $0x88] ss:$28 sps:$4 sm:$0xff]  }
 0x133   : > { %v607_v47 = vmax.f32 %v574_v42, 0.0  ;;  %1760 = vmatprep.subr.bf16.mxu0 %v2893_v52  ;;  %v2906_v27 = vld [vmem:[%s4270_s5 + $0xb8] ss:$28 sps:$4 sm:$0xff]  }
 0x134   : > { %v622_v48 = vpack.c.bf16 %v606_v45, %v604_v44  ;;  %v3739_v44 = vld [vmem:[%s4270_s5 + $0x280] ss:$28 sps:$4 sm:$0xff]   ;;  %v2911_v52 = vld [vmem:[%s4270_s5 + $0xf4] ss:$28 sps:$4 sm:$0xff]  }
 0x135   : > { %v623_v49 = vpack.c.bf16 %v607_v47, %v605_v46  ;;  %1870 = vmatpush1.bf16.msra.mxu1 %v2882_v43  ;;  %v2908_v43 = vld [vmem:[%s4270_s5 + $0xbc] ss:$28 sps:$4 sm:$0xff]  }
 0x136   : > { %1871 = vmatprep.subr.bf16.mxu1 %v2890_v28  ;;  %1761 = vmatpush1.bf16.msra.mxu0 %v2891_v54  ;;  %v3755_v28 = vld [vmem:[%s4270_s5 + $0xc0] ss:$28 sps:$4 sm:$0xff]  }
 0x137   : > { %930 = vmatprep.mubr.bf16.mxu1 %v623_v49  ;;  %1956 = vmatprep.subr.bf16.mxu0 %v2899_v56 }
 0x138   : > { %931 = vmatmul.mubr.bf16.gmra.mrb[28].mxu1 %v622_v48 }
 0x139   : > { %1872 = vmatpush1.bf16.msra.mxu1 %v2888_v51 }
 0x13a   : > { %1873 = vmatprep.subr.bf16.mxu1 %v2896_v53  ;;  %v3764_v53 = vld [vmem:[%s4270_s5 + $0x2b8] ss:$28 sps:$4 sm:$0xff]  }
 0x13d   : > { %1874 = vmatpush1.bf16.msra.mxu1 %v2894_v55 }
 0x13e   : > { %2699 = vmatprep.subr.bf16.mxu1 %v3656_v57 }
 0x1d3   : > { %v862_v61 = vpop.f32.mrb[0].mxu1 }
 0x1d4   : > { %v863_v62 = vadd.f32 %v862_v61, %v3663_v59  ;;  %v864_v63 = vpop.f32.mrb[1].mxu1 }
 0x1d5   : > { %v865_v0 = vadd.f32 %v864_v63, %v3666_v60  ;;  %v866_v1 = vpop.f32.mrb[2].mxu1  ;;  %v3777_v63 = vld [vmem:[%s4270_s5 + $0xf8] ss:$28 sps:$4 sm:$0xff]  }
 0x1d6   : > { %v867_v2 = vadd.f32 %v866_v1, %v3663_v59  ;;  %v868_v3 = vpop.f32.mrb[3].mxu1  ;;  %v941_v5 = vmax.f32 %v863_v62, 0.0  ;;  %v2909_v62 = vld [vmem:[%s4270_s5 + $0xf0] ss:$28 sps:$4 sm:$0xff]  }
 0x1d7   : > { %v869_v4 = vadd.f32 %v868_v3, %v3666_v60  ;;  %v942_v7 = vmax.f32 %v865_v0, 0.0  ;;  %v3787_v3 = vld [vmem:[%s4270_s5 + $0x2f0] ss:$28 sps:$4 sm:$0xff]  }
 0x1d8   : > { %v943_v6 = vmax.f32 %v867_v2, 0.0  ;;  %v2914_v2 = vld [vmem:[%s4270_s5 + $0x12c] ss:$28 sps:$4 sm:$0xff]  }
 0x1d9   : > { %v944_v8 = vmax.f32 %v869_v4, 0.0 }
 0x1da   : > { %v3672_v9 = vpack.c.bf16 %v943_v6, %v941_v5 }
 0x1db   : > { %v3674_v10 = vpack.c.bf16 %v944_v8, %v942_v7  ;;  %v872_v11 = vpop.f32.mrb[4].mxu1 }
 0x1dc   : > { %v873_v14 = vadd.f32 %v872_v11, %v3663_v59  ;;  %v874_v15 = vpop.f32.mrb[5].mxu1  ;;  %v2912_v11 = vld [vmem:[%s4270_s5 + $0x128] ss:$28 sps:$4 sm:$0xff]  }
 0x1dd   : > { %v875_v18 = vadd.f32 %v874_v15, %v3666_v60  ;;  %v876_v19 = vpop.f32.mrb[6].mxu1  ;;  %1762 = vmatprep.mubr.bf16.mxu0 %v3674_v10  ;;  %1875 = vmatprep.mubr.bf16.mxu1 %v3674_v10 }
 0x1de   : > { %v877_v20 = vadd.f32 %v876_v19, %v3663_v59  ;;  %v878_v21 = vpop.f32.mrb[7].mxu1  ;;  %1763 = vmatmul.mubr.bf16.vlgmr.msra.gmra.mrb[32].mxu0 %v3672_v9  ;;  %1876 = vmatmul.mubr.bf16.vlgmr.msra.gmra.mrb[32].mxu1 %v3672_v9  ;;  %v945_v30 = vmax.f32 %v873_v14, 0.0 }
 0x1df   : > { %v879_v23 = vadd.f32 %v878_v21, %v3666_v60  ;;  %1957 = vmatpush1.bf16.msra.mxu0 %v2897_v12  ;;  %2707 = vmatpush3.bf16.msra.mxu1 %v3682_v13  ;;  %v946_v34 = vmax.f32 %v875_v18, 0.0  ;;  %v3803_v12 = vld [vmem:[%s4270_s5 + $0x130] ss:$28 sps:$4 sm:$0xff]   ;;  %v3812_v18 = vld [vmem:[%s4270_s5 + $0x328] ss:$28 sps:$4 sm:$0xff]  }
 0x1e0   : > { %v947_v31 = vmax.f32 %v877_v20, 0.0  ;;  %1958 = vmatprep.subr.bf16.mxu0 %v2902_v16  ;;  %2700 = vmatprep.subr.bf16.mxu1 %v3691_v17  ;;  %v2917_v16 = vld [vmem:[%s4270_s5 + $0x164] ss:$28 sps:$4 sm:$0xff]  }
 0x1e1   : > { %v948_v35 = vmax.f32 %v879_v23, 0.0 }
 0x1e2   : > { %v3718_v36 = vpack.c.bf16 %v947_v31, %v945_v30  ;;  %v2915_v30 = vld [vmem:[%s4270_s5 + $0x160] ss:$28 sps:$4 sm:$0xff]   ;;  %v3825_v31 = vld [vmem:[%s4270_s5 + $0x168] ss:$28 sps:$4 sm:$0xff]  }
 0x1e3   : > { %v3720_v37 = vpack.c.bf16 %v948_v35, %v946_v34  ;;  %1959 = vmatpush1.bf16.msra.mxu0 %v2900_v25  ;;  %v882_v38 = vpop.f32.mrb[8].mxu1  ;;  %2708 = vmatpush3.bf16.msra.mxu1 %v3707_v29  ;;  %v2920_v35 = vld [vmem:[%s4270_s5 + $0x19c] ss:$28 sps:$4 sm:$0xff]  }
 0x1e4   : > { %v883_v41 = vadd.f32 %v882_v38, %v3663_v59  ;;  %v884_v42 = vpop.f32.mrb[9].mxu1  ;;  %1960 = vmatprep.subr.bf16.mxu0 %v2905_v32  ;;  %2701 = vmatprep.subr.bf16.mxu1 %v3716_v33  ;;  %v3835_v38 = vld [vmem:[%s4270_s5 + $0x360] ss:$28 sps:$4 sm:$0xff]  }
 0x1e5   : > { %v885_v45 = vadd.f32 %v884_v42, %v3666_v60  ;;  %v886_v46 = vpop.f32.mrb[10].mxu1  ;;  %1772 = vmatprep.mubr.bf16.mxu0 %v3720_v37  ;;  %1885 = vmatprep.mubr.bf16.mxu1 %v3720_v37 }
 0x1e6   : > { %v887_v47 = vadd.f32 %v886_v46, %v3663_v59  ;;  %v888_v48 = vpop.f32.mrb[11].mxu1  ;;  %1773 = vmatmul.mubr.bf16.gmra.mrb[36].mxu0 %v3718_v36  ;;  %1886 = vmatmul.mubr.bf16.gmra.mrb[36].mxu1 %v3718_v36  ;;  %v949_v50 = vmax.f32 %v883_v41, 0.0  ;;  %v2918_v46 = vld [vmem:[%s4270_s5 + $0x198] ss:$28 sps:$4 sm:$0xff]  }
 0x1e7   : > { %v889_v49 = vadd.f32 %v888_v48, %v3666_v60  ;;  %1961 = vmatpush1.bf16.msra.mxu0 %v2903_v39  ;;  %2709 = vmatpush3.bf16.msra.mxu1 %v3729_v40  ;;  %v950_v54 = vmax.f32 %v885_v45, 0.0 }
 0x1e8   : > { %v951_v51 = vmax.f32 %v887_v47, 0.0  ;;  %1962 = vmatprep.subr.bf16.mxu0 %v2908_v43  ;;  %2702 = vmatprep.subr.bf16.mxu1 %v3739_v44  ;;  %v3851_v47 = vld [vmem:[%s4270_s5 + $0x1a0] ss:$28 sps:$4 sm:$0xff]  }
 0x1e9   : > { %v952_v55 = vmax.f32 %v889_v49, 0.0 }
 0x1ea   : > { %v3766_v56 = vpack.c.bf16 %v951_v51, %v949_v50 }
 0x1eb   : > { %v3768_v58 = vpack.c.bf16 %v952_v55, %v950_v54  ;;  %1963 = vmatpush1.bf16.msra.mxu0 %v2906_v27  ;;  %v892_v61 = vpop.f32.mrb[12].mxu1  ;;  %2710 = vmatpush3.bf16.msra.mxu1 %v3755_v28  ;;  %v2923_v27 = vld [vmem:[%s4270_s5 + $0x1d4] ss:$28 sps:$4 sm:$0xff]  }
 0x1ec   : > { %v893_v0 = vadd.f32 %v892_v61, %v3663_v59  ;;  %v894_v1 = vpop.f32.mrb[13].mxu1  ;;  %1964 = vmatprep.subr.bf16.mxu0 %v2911_v52  ;;  %2703 = vmatprep.subr.bf16.mxu1 %v3764_v53  ;;  %v2921_v61 = vld [vmem:[%s4270_s5 + $0x1d0] ss:$28 sps:$4 sm:$0xff]  }
 0x1ed   : > { %v895_v4 = vadd.f32 %v894_v1, %v3666_v60  ;;  %v896_v5 = vpop.f32.mrb[14].mxu1  ;;  %1782 = vmatprep.mubr.bf16.mxu0 %v3768_v58  ;;  %1895 = vmatprep.mubr.bf16.mxu1 %v3768_v58  ;;  %v2928_v1 = vld [vmem:[%s4270_s5 + $0x20c] ss:$28 sps:$4 sm:$0xff]  }
 0x1ee   : > { %v897_v6 = vadd.f32 %v896_v5, %v3663_v59  ;;  %v898_v7 = vpop.f32.mrb[15].mxu1  ;;  %1783 = vmatmul.mubr.bf16.gmra.mrb[40].mxu0 %v3766_v56  ;;  %1896 = vmatmul.mubr.bf16.gmra.mrb[40].mxu1 %v3766_v56  ;;  %v953_v14 = vmax.f32 %v893_v0, 0.0 }
 0x1ef   : > { %v899_v8 = vadd.f32 %v898_v7, %v3666_v60  ;;  %1965 = vmatpush1.bf16.msra.mxu0 %v2909_v62  ;;  %2711 = vmatpush3.bf16.msra.mxu1 %v3777_v63  ;;  %v954_v19 = vmax.f32 %v895_v4, 0.0 }
 0x1f0   : > { %v955_v15 = vmax.f32 %v897_v6, 0.0  ;;  %1966 = vmatprep.subr.bf16.mxu0 %v2914_v2  ;;  %2704 = vmatprep.subr.bf16.mxu1 %v3787_v3 }
 0x1f1   : > { %v956_v20 = vmax.f32 %v899_v8, 0.0  ;;  %v2926_v8 = vld [vmem:[%s4270_s5 + $0x208] ss:$28 sps:$4 sm:$0xff]  }
 0x1f2   : > { %v3814_v21 = vpack.c.bf16 %v955_v15, %v953_v14  ;;  %v2933_v15 = vld [vmem:[%s4270_s5 + $0x244] ss:$28 sps:$4 sm:$0xff]  }
 0x1f3   : > { %v3816_v23 = vpack.c.bf16 %v956_v20, %v954_v19  ;;  %1967 = vmatpush1.bf16.msra.mxu0 %v2912_v11  ;;  %v902_v25 = vpop.f32.mrb[16].mxu1  ;;  %2712 = vmatpush3.bf16.msra.mxu1 %v3803_v12 }
 0x1f4   : > { %v903_v32 = vadd.f32 %v902_v25, %v3663_v59  ;;  %v904_v34 = vpop.f32.mrb[17].mxu1  ;;  %1968 = vmatprep.subr.bf16.mxu0 %v2917_v16  ;;  %2705 = vmatprep.subr.bf16.mxu1 %v3812_v18 }
 0x1f5   : > { %v905_v39 = vadd.f32 %v904_v34, %v3666_v60  ;;  %v906_v41 = vpop.f32.mrb[18].mxu1  ;;  %1792 = vmatprep.mubr.bf16.mxu0 %v3816_v23  ;;  %1905 = vmatprep.mubr.bf16.mxu1 %v3816_v23 }
 0x1f6   : > { %v907_v42 = vadd.f32 %v906_v41, %v3663_v59  ;;  %v908_v43 = vpop.f32.mrb[19].mxu1  ;;  %1793 = vmatmul.mubr.bf16.gmra.mrb[44].mxu0 %v3814_v21  ;;  %1906 = vmatmul.mubr.bf16.gmra.mrb[44].mxu1 %v3814_v21  ;;  %v957_v48 = vmax.f32 %v903_v32, 0.0  ;;  %v2931_v32 = vld [vmem:[%s4270_s5 + $0x240] ss:$28 sps:$4 sm:$0xff]  }
 0x1f7   : > { %v909_v45 = vadd.f32 %v908_v43, %v3666_v60  ;;  %1969 = vmatpush1.bf16.msra.mxu0 %v2915_v30  ;;  %2713 = vmatpush3.bf16.msra.mxu1 %v3825_v31  ;;  %v958_v50 = vmax.f32 %v905_v39, 0.0  ;;  %v2938_v39 = vld [vmem:[%s4270_s5 + $0x27c] ss:$28 sps:$4 sm:$0xff]  }
 0x1f8   : > { %v959_v49 = vmax.f32 %v907_v42, 0.0  ;;  %1970 = vmatprep.subr.bf16.mxu0 %v2920_v35  ;;  %2706 = vmatprep.subr.bf16.mxu1 %v3835_v38 }
 0x1f9   : > { %v960_v51 = vmax.f32 %v909_v45, 0.0 }
 0x1fa   : > { %v3857_v52 = vpack.c.bf16 %v959_v49, %v957_v48  ;;  %v2936_v48 = vld [vmem:[%s4270_s5 + $0x278] ss:$28 sps:$4 sm:$0xff]  }
 0x1fb   : > { %v3859_v54 = vpack.c.bf16 %v960_v51, %v958_v50  ;;  %1971 = vmatpush1.bf16.msra.mxu0 %v2918_v46  ;;  %v912_v55 = vpop.f32.mrb[20].mxu1  ;;  %2714 = vmatpush3.bf16.msra.mxu1 %v3851_v47  ;;  %v2943_v50 = vld [vmem:[%s4270_s5 + $0x2b4] ss:$28 sps:$4 sm:$0xff]  }
 0x1fc   : > { %v913_v62 = vadd.f32 %v912_v55, %v3663_v59  ;;  %v914_v0 = vpop.f32.mrb[21].mxu1  ;;  %1972 = vmatprep.subr.bf16.mxu0 %v2923_v27 }
 0x1fd   : > { %v915_v2 = vadd.f32 %v914_v0, %v3666_v60  ;;  %v916_v4 = vpop.f32.mrb[22].mxu1  ;;  %1802 = vmatprep.mubr.bf16.mxu0 %v3859_v54  ;;  %1915 = vmatprep.mubr.bf16.mxu1 %v3859_v54 }
 0x1fe   : > { %v917_v5 = vadd.f32 %v916_v4, %v3663_v59  ;;  %v918_v6 = vpop.f32.mrb[23].mxu1  ;;  %1803 = vmatmul.mubr.bf16.gmra.mrb[48].mxu0 %v3857_v52  ;;  %1916 = vmatmul.mubr.bf16.gmra.mrb[48].mxu1 %v3857_v52  ;;  %v961_v11 = vmax.f32 %v913_v62, 0.0 }
 0x1ff   : > { %v919_v7 = vadd.f32 %v918_v6, %v3666_v60  ;;  %1973 = vmatpush1.bf16.msra.mxu0 %v2921_v61  ;;  %v962_v16 = vmax.f32 %v915_v2, 0.0 }
 0x200   : > { %v963_v14 = vmax.f32 %v917_v5, 0.0  ;;  %1974 = vmatprep.subr.bf16.mxu0 %v2928_v1  ;;  %v2941_v1 = vld [vmem:[%s4270_s5 + $0x2b0] ss:$28 sps:$4 sm:$0xff]  }
 0x201   : > { %v964_v19 = vmax.f32 %v919_v7, 0.0  ;;  %v2948_v5 = vld [vmem:[%s4270_s5 + $0x2ec] ss:$28 sps:$4 sm:$0xff]  }
 0x202   : > { %v3882_v20 = vpack.c.bf16 %v963_v14, %v961_v11 }
 0x203   : > { %v3884_v25 = vpack.c.bf16 %v964_v19, %v962_v16  ;;  %1975 = vmatpush1.bf16.msra.mxu0 %v2926_v8  ;;  %v922_v30 = vpop.f32.mrb[24].mxu1 }
 0x204   : > { %v923_v34 = vadd.f32 %v922_v30, %v3663_v59  ;;  %v924_v35 = vpop.f32.mrb[25].mxu1  ;;  %1976 = vmatprep.subr.bf16.mxu0 %v2933_v15  ;;  %v2946_v15 = vld [vmem:[%s4270_s5 + $0x2e8] ss:$28 sps:$4 sm:$0xff]  }
 0x205   : > { %v925_v41 = vadd.f32 %v924_v35, %v3666_v60  ;;  %v926_v42 = vpop.f32.mrb[26].mxu1  ;;  %1812 = vmatprep.mubr.bf16.mxu0 %v3884_v25  ;;  %1925 = vmatprep.mubr.bf16.mxu1 %v3884_v25  ;;  %v2953_v30 = vld [vmem:[%s4270_s5 + $0x324] ss:$28 sps:$4 sm:$0xff]  }
 0x206   : > { %v927_v43 = vadd.f32 %v926_v42, %v3663_v59  ;;  %v928_v45 = vpop.f32.mrb[27].mxu1  ;;  %1813 = vmatmul.mubr.bf16.gmra.mrb[52].mxu0 %v3882_v20  ;;  %1926 = vmatmul.mubr.bf16.gmra.mrb[52].mxu1 %v3882_v20  ;;  %v965_v49 = vmax.f32 %v923_v34, 0.0 }
 0x207   : > { %v929_v46 = vadd.f32 %v928_v45, %v3666_v60  ;;  %1977 = vmatpush1.bf16.msra.mxu0 %v2931_v32  ;;  %v966_v51 = vmax.f32 %v925_v41, 0.0  ;;  %v2956_v41 = vld [vmem:[%s4270_s5 + $0x358] ss:$28 sps:$4 sm:$0xff]  }
 0x208   : > { %v967_v27 = vmax.f32 %v927_v43, 0.0  ;;  %1978 = vmatprep.subr.bf16.mxu0 %v2938_v39  ;;  %v2958_v39 = vld [vmem:[%s4270_s5 + $0x35c] ss:$28 sps:$4 sm:$0xff]  }
 0x209   : > { %v968_v55 = vmax.f32 %v929_v46, 0.0 }
 0x20a   : > { %v3906_v61 = vpack.c.bf16 %v967_v27, %v965_v49 }
 0x20b   : > { %v3908_v62 = vpack.c.bf16 %v968_v55, %v966_v51  ;;  %1979 = vmatpush1.bf16.msra.mxu0 %v2936_v48  ;;  %v932_v0 = vpop.f32.mrb[28].mxu1 }
 0x20c   : > { %v933_v2 = vadd.f32 %v932_v0, %v3663_v59  ;;  %v934_v4 = vpop.f32.mrb[29].mxu1  ;;  %1980 = vmatprep.subr.bf16.mxu0 %v2943_v50 }
 0x20d   : > { %v935_v6 = vadd.f32 %v934_v4, %v3666_v60  ;;  %v936_v7 = vpop.f32.mrb[30].mxu1  ;;  %1822 = vmatprep.mubr.bf16.mxu0 %v3908_v62  ;;  %1935 = vmatprep.mubr.bf16.mxu1 %v3908_v62 }
 0x20e   : > { %v937_v8 = vadd.f32 %v936_v7, %v3663_v59  ;;  %v938_v11 = vpop.f32.mrb[31].mxu1  ;;  %1823 = vmatmul.mubr.bf16.gmra.mrb[56].mxu0 %v3906_v61  ;;  %1936 = vmatmul.mubr.bf16.gmra.mrb[56].mxu1 %v3906_v61  ;;  %v969_v16 = vmax.f32 %v933_v2, 0.0 }
 0x20f   : > { %v939_v14 = vadd.f32 %v938_v11, %v3666_v60  ;;  %1981 = vmatpush1.bf16.msra.mxu0 %v2941_v1  ;;  %v970_v59 = vmax.f32 %v935_v6, 0.0  ;;  %v2951_v60 = vld [vmem:[%s4270_s5 + $0x320] ss:$28 sps:$4 sm:$0xff]  }
 0x210   : > { %v971_v19 = vmax.f32 %v937_v8, 0.0  ;;  %1982 = vmatprep.subr.bf16.mxu0 %v2948_v5 }
 0x211   : > { %v972_v32 = vmax.f32 %v939_v14, 0.0 }
 0x212   : > { %v987_v34 = vpack.c.bf16 %v971_v19, %v969_v16 }
 0x213   : > { %v988_v35 = vpack.c.bf16 %v972_v32, %v970_v59  ;;  %1983 = vmatpush1.bf16.msra.mxu0 %v2946_v15 }
 0x214   : > { %1984 = vmatprep.subr.bf16.mxu0 %v2953_v30 }
 0x215   : > { %1832 = vmatprep.mubr.bf16.mxu0 %v988_v35  ;;  %1945 = vmatprep.mubr.bf16.mxu1 %v988_v35 }
 0x216   : > { %1833 = vmatmul.mubr.bf16.gmra.mrb[60].mxu0 %v987_v34  ;;  %1946 = vmatmul.mubr.bf16.gmra.mrb[60].mxu1 %v987_v34 }
 0x217   : > { %1985 = vmatpush1.bf16.msra.mxu0 %v2951_v60  ;;  %1988 = vmatprep.mubr.bf16.mxu0 %v3674_v10 }
 0x218   : > { %2117 = vmatprep.mubr.bf16.mxu1 %v3768_v58  ;;  %1986 = vmatprep.subr.bf16.mxu0 %v2958_v39 }
 0x21b   : > { %1987 = vmatpush1.bf16.msra.mxu0 %v2956_v41 }
 0x21c   : > { %2635 = vmatprep.subr.bf16.mxu0 %v3656_v57  ;;  %v1129_v57 = vsub.s32 2, %v3493_v22 }
 0x21e   : > { %1989 = vmatmul.mubr.bf16.vlgmr.msra.gmra.mrb[64].mxu0 %v3672_v9  ;;  %2118 = vmatmul.mubr.bf16.vlgmr.msra.gmra.mrb[64].mxu1 %v3766_v56 }
 0x21f   : > { %2636 = vmatpush3.bf16.msra.mxu0 %v3682_v13  ;;  %1998 = vmatprep.mubr.bf16.mxu0 %v3720_v37  ;;  %v3987_v13 = vld [vmem:[%s4271_s6] sm:$0x7f] }
 0x220   : > { %2125 = vmatprep.mubr.bf16.mxu1 %v3816_v23  ;;  %2637 = vmatprep.subr.bf16.mxu0 %v3691_v17  ;;  %v1133_v17 = vsub.s32 3, %v3493_v22 }
 0x223   : > { %2638 = vmatpush3.bf16.msra.mxu0 %v3707_v29  ;;  %v3992_v29 = vrot.slane %v3987_v13, %v3499_v24 }
 0x224   : > { %2639 = vmatprep.subr.bf16.mxu0 %v3716_v33  ;;  %v4002_v33 = vrot.slane %v3987_v13, %v1133_v17 }
 0x226   : > { %1999 = vmatmul.mubr.bf16.gmra.mrb[68].mxu0 %v3718_v36  ;;  %2126 = vmatmul.mubr.bf16.gmra.mrb[68].mxu1 %v3814_v21 }
 0x227   : > { %2008 = vmatprep.mubr.bf16.mxu0 %v3768_v58  ;;  %2133 = vmatprep.mubr.bf16.mxu1 %v3859_v54 }
 0x228   : > { %2640 = vmatpush3.bf16.msra.mxu0 %v3729_v40 }
 0x229   : > { %2641 = vmatprep.subr.bf16.mxu0 %v3739_v44 }
 0x22c   : > { %2642 = vmatpush3.bf16.msra.mxu0 %v3755_v28 }
 0x22d   : > { %2643 = vmatprep.subr.bf16.mxu0 %v3764_v53 }
 0x22e   : > { %2009 = vmatmul.mubr.bf16.gmra.mrb[72].mxu0 %v3766_v56  ;;  %2134 = vmatmul.mubr.bf16.gmra.mrb[72].mxu1 %v3857_v52 }
 0x22f   : > { %2018 = vmatprep.mubr.bf16.mxu0 %v3816_v23  ;;  %2141 = vmatprep.mubr.bf16.mxu1 %v3884_v25 }
 0x230   : > { %2644 = vmatpush3.bf16.msra.mxu0 %v3777_v63 }
 0x231   : > { %2645 = vmatprep.subr.bf16.mxu0 %v3787_v3 }
 0x234   : > { %2646 = vmatpush3.bf16.msra.mxu0 %v3803_v12 }
 0x235   : > { %2647 = vmatprep.subr.bf16.mxu0 %v3812_v18 }
 0x236   : > { %2019 = vmatmul.mubr.bf16.gmra.mrb[76].mxu0 %v3814_v21  ;;  %2142 = vmatmul.mubr.bf16.gmra.mrb[76].mxu1 %v3882_v20 }
 0x237   : > { %2028 = vmatprep.mubr.bf16.mxu0 %v3859_v54  ;;  %2149 = vmatprep.mubr.bf16.mxu1 %v3908_v62 }
 0x238   : > { %2648 = vmatpush3.bf16.msra.mxu0 %v3825_v31 }
 0x239   : > { %2649 = vmatprep.subr.bf16.mxu0 %v3835_v38 }
 0x23c   : > { %2650 = vmatpush3.bf16.msra.mxu0 %v3851_v47 }
 0x23e   : > { %2029 = vmatmul.mubr.bf16.gmra.mrb[80].mxu0 %v3857_v52  ;;  %2150 = vmatmul.mubr.bf16.gmra.mrb[80].mxu1 %v3906_v61 }
 0x23f   : > { %2038 = vmatprep.mubr.bf16.mxu0 %v3884_v25  ;;  %2157 = vmatprep.mubr.bf16.mxu1 %v988_v35 }
 0x246   : > { %2039 = vmatmul.mubr.bf16.gmra.mrb[84].mxu0 %v3882_v20  ;;  %2158 = vmatmul.mubr.bf16.gmra.mrb[84].mxu1 %v987_v34 }
 0x247   : > { %2048 = vmatprep.mubr.bf16.mxu0 %v3908_v62 }
 0x24e   : > { %2049 = vmatmul.mubr.bf16.gmra.mrb[88].mxu0 %v3906_v61 }
 0x24f   : > { %2058 = vmatprep.mubr.bf16.mxu0 %v988_v35 }
 0x256   : > { %2059 = vmatmul.mubr.bf16.gmra.mrb[92].mxu0 %v987_v34 }
 0x257   : > { %2101 = vmatprep.mubr.bf16.mxu0 %v3674_v10  ;;  %v3995_v10 = vrot.slane %v3987_v13, %v1129_v57 }
 0x25e   : > { %2102 = vmatmul.mubr.bf16.vlgmr.msra.gmra.mrb[96].mxu0 %v3672_v9  ;;  %v3999_v9 = vrot.slane %v3987_v13, %v3505_v26 }
 0x25f   : > { %2109 = vmatprep.mubr.bf16.mxu0 %v3720_v37 }
 0x266   : > { %2110 = vmatmul.mubr.bf16.gmra.mrb[100].mxu0 %v3718_v36 }
 0x2b1   : > { %v1764_v36 = vpop.f32.mrb[32].mxu0  ;;  %v1877_v37 = vpop.f32.mrb[32].mxu1 }
 0x2b2   : > { %v1765_v40 = vadd.f32 %v1764_v36, %v3992_v29  ;;  %v1878_v44 = vadd.f32 %v1877_v37, %v3995_v10  ;;  %v1766_v28 = vpop.f32.mrb[33].mxu0  ;;  %v1879_v24 = vpop.f32.mrb[33].mxu1 }
 0x2b3   : > { %v1767_v53 = vadd.f32 %v1766_v28, %v3999_v9  ;;  %v1880_v56 = vadd.f32 %v1879_v24, %v4002_v33  ;;  %v1768_v58 = vpop.f32.mrb[34].mxu0  ;;  %v1881_v63 = vpop.f32.mrb[34].mxu1 }
 0x2b4   : > { %2961 = vtanh.f32 %v1765_v40  ;;  %v1769_v26 = vadd.f32 %v1768_v58, %v3992_v29  ;;  %v1770_v3 = vpop.f32.mrb[35].mxu0  ;;  %v1883_v12 = vpop.f32.mrb[35].mxu1  ;;  %v1882_v18 = vadd.f32 %v1881_v63, %v3995_v10 }
 0x2b5   : > { %2963 = vtanh.f32 %v1878_v44  ;;  %v1771_v21 = vadd.f32 %v1770_v3, %v3999_v9  ;;  %v1884_v23 = vadd.f32 %v1883_v12, %v4002_v33 }
 0x2b6   : > { %2965 = vtanh.f32 %v1767_v53 }
 0x2b7   : > { %2967 = vtanh.f32 %v1880_v56 }
 0x2b8   : > { %2969 = vtanh.f32 %v1769_v26 }
 0x2b9   : > { %2971 = vtanh.f32 %v1882_v18  ;;  %v1774_v31 = vpop.f32.mrb[36].mxu0  ;;  %v1887_v38 = vpop.f32.mrb[36].mxu1 }
 0x2ba   : > { %2973 = vtanh.f32 %v1771_v21  ;;  %v1775_v47 = vadd.f32 %v1774_v31, %v3992_v29  ;;  %v1888_v52 = vadd.f32 %v1887_v38, %v3995_v10  ;;  %v1776_v54 = vpop.f32.mrb[37].mxu0  ;;  %v1889_v20 = vpop.f32.mrb[37].mxu1 }
 0x2bb   : > { %2975 = vtanh.f32 %v1884_v23  ;;  %v1777_v25 = vadd.f32 %v1776_v54, %v3999_v9  ;;  %v1890_v42 = vadd.f32 %v1889_v20, %v4002_v33  ;;  %v1778_v43 = vpop.f32.mrb[38].mxu0  ;;  %v1891_v45 = vpop.f32.mrb[38].mxu1 }
 0x2bc   : > { %2977 = vtanh.f32 %v1775_v47  ;;  %v1779_v46 = vadd.f32 %v1778_v43, %v3992_v29  ;;  %v1780_v48 = vpop.f32.mrb[39].mxu0  ;;  %v1893_v49 = vpop.f32.mrb[39].mxu1  ;;  %v1892_v27 = vadd.f32 %v1891_v45, %v3995_v10 }
 0x2bd   : > { %2979 = vtanh.f32 %v1888_v52  ;;  %v1781_v51 = vadd.f32 %v1780_v48, %v3999_v9  ;;  %v1894_v61 = vadd.f32 %v1893_v49, %v4002_v33 }
 0x2be   : > { %v2962_v50 = vpop.eup %2961  ;;  %2981 = vtanh.f32 %v1777_v25 }
 0x2bf   : > { %v2964_v55 = vpop.eup %2963  ;;  %2278 = vst [vmem:[%s4020_s17] sm:$0xff] %v2962_v50  ;;  %2983 = vtanh.f32 %v1890_v42 }
 0x2c0   : > { %v2966_v62 = vpop.eup %2965  ;;  %2280 = vst [vmem:[%s4020_s17 + $0x10] sm:$0xff] %v2964_v55  ;;  %2985 = vtanh.f32 %v1779_v46 }
 0x2c1   : > { %v2968_v0 = vpop.eup %2967  ;;  %2279 = vst [vmem:[%s4020_s17 + $0x8] sm:$0xff] %v2966_v62  ;;  %2987 = vtanh.f32 %v1892_v27  ;;  %v1784_v1 = vpop.f32.mrb[40].mxu0 }
 0x2c2   : > { %v1897_v2 = vpop.f32.mrb[40].mxu1  ;;  %v2970_v4 = vpop.eup %2969  ;;  %2281 = vst [vmem:[%s4020_s17 + $0x18] sm:$0xff] %v2968_v0  ;;  %2989 = vtanh.f32 %v1781_v51  ;;  %v1785_v5 = vadd.f32 %v1784_v1, %v3992_v29 }
 0x2c3   : > { %v1898_v6 = vadd.f32 %v1897_v2, %v3995_v10  ;;  %v1786_v7 = vpop.f32.mrb[41].mxu0  ;;  %v1899_v8 = vpop.f32.mrb[41].mxu1  ;;  %2286 = vst [vmem:[%s4020_s17 + $0x38] sm:$0xff] %v2970_v4  ;;  %2991 = vtanh.f32 %v1894_v61 }
 0x2c4   : > { %v2972_v11 = vpop.eup %2971  ;;  %v1787_v14 = vadd.f32 %v1786_v7, %v3999_v9  ;;  %v1900_v15 = vadd.f32 %v1899_v8, %v4002_v33  ;;  %v1788_v16 = vpop.f32.mrb[42].mxu0  ;;  %2993 = vtanh.f32 %v1785_v5 }
 0x2c5   : > { %v1901_v19 = vpop.f32.mrb[42].mxu1  ;;  %v2974_v30 = vpop.eup %2973  ;;  %2288 = vst [vmem:[%s4020_s17 + $0x48] sm:$0xff] %v2972_v11  ;;  %v1789_v59 = vadd.f32 %v1788_v16, %v3992_v29  ;;  %2995 = vtanh.f32 %v1898_v6 }
 0x2c6   : > { %v1790_v32 = vpop.f32.mrb[43].mxu0  ;;  %v1903_v34 = vpop.f32.mrb[43].mxu1  ;;  %2287 = vst [vmem:[%s4020_s17 + $0x40] sm:$0xff] %v2974_v30  ;;  %v1902_v60 = vadd.f32 %v1901_v19, %v3995_v10  ;;  %2997 = vtanh.f32 %v1787_v14 }
 0x2c7   : > { %v2976_v35 = vpop.eup %2975  ;;  %v1791_v41 = vadd.f32 %v1790_v32, %v3999_v9  ;;  %2999 = vtanh.f32 %v1900_v15  ;;  %v1904_v17 = vadd.f32 %v1903_v34, %v4002_v33 }
 0x2c8   : > { %v2978_v39 = vpop.eup %2977  ;;  %2289 = vst [vmem:[%s4020_s17 + $0x50] sm:$0xff] %v2976_v35  ;;  %3001 = vtanh.f32 %v1789_v59 }
 0x2c9   : > { %v2980_v57 = vpop.eup %2979  ;;  %2293 = vst [vmem:[%s4020_s17 + $0x70] sm:$0xff] %v2978_v39  ;;  %3003 = vtanh.f32 %v1902_v60  ;;  %v1794_v40 = vpop.f32.mrb[44].mxu0 }
 0x2ca   : > { %v2982_v36 = vpop.eup %2981  ;;  %2295 = vst [vmem:[%s4020_s17 + $0x80] sm:$0xff] %v2980_v57  ;;  %v1907_v44 = vpop.f32.mrb[44].mxu1  ;;  %3005 = vtanh.f32 %v1791_v41  ;;  %v1795_v24 = vadd.f32 %v1794_v40, %v3992_v29 }
 0x2cb   : > { %v2984_v37 = vpop.eup %2983  ;;  %2294 = vst [vmem:[%s4020_s17 + $0x78] sm:$0xff] %v2982_v36  ;;  %v1908_v53 = vadd.f32 %v1907_v44, %v3995_v10  ;;  %v1796_v56 = vpop.f32.mrb[45].mxu0  ;;  %3007 = vtanh.f32 %v1904_v17 }
 0x2cc   : > { %v2986_v28 = vpop.eup %2985  ;;  %2296 = vst [vmem:[%s4020_s17 + $0x88] sm:$0xff] %v2984_v37  ;;  %v1909_v58 = vpop.f32.mrb[45].mxu1  ;;  %v1797_v26 = vadd.f32 %v1796_v56, %v3999_v9  ;;  %3009 = vtanh.f32 %v1795_v24 }
 0x2cd   : > { %v2988_v63 = vpop.eup %2987  ;;  %2300 = vst [vmem:[%s4020_s17 + $0xa8] sm:$0xff] %v2986_v28  ;;  %v1910_v3 = vadd.f32 %v1909_v58, %v4002_v33  ;;  %v1798_v12 = vpop.f32.mrb[46].mxu0  ;;  %3011 = vtanh.f32 %v1908_v53 }
 0x2ce   : > { %v1911_v18 = vpop.f32.mrb[46].mxu1  ;;  %v2990_v21 = vpop.eup %2989  ;;  %2302 = vst [vmem:[%s4020_s17 + $0xb8] sm:$0xff] %v2988_v63  ;;  %v1799_v23 = vadd.f32 %v1798_v12, %v3992_v29  ;;  %3013 = vtanh.f32 %v1797_v26 }
 0x2cf   : > { %v1800_v31 = vpop.f32.mrb[47].mxu0  ;;  %v1913_v38 = vpop.f32.mrb[47].mxu1  ;;  %2301 = vst [vmem:[%s4020_s17 + $0xb0] sm:$0xff] %v2990_v21  ;;  %v1912_v52 = vadd.f32 %v1911_v18, %v3995_v10  ;;  %3015 = vtanh.f32 %v1910_v3 }
 0x2d0   : > { %v2992_v47 = vpop.eup %2991  ;;  %v1801_v20 = vadd.f32 %v1800_v31, %v3999_v9  ;;  %v1914_v42 = vadd.f32 %v1913_v38, %v4002_v33  ;;  %3017 = vtanh.f32 %v1799_v23 }
 0x2d1   : > { %v2994_v54 = vpop.eup %2993  ;;  %2303 = vst [vmem:[%s4020_s17 + $0xc0] sm:$0xff] %v2992_v47  ;;  %3019 = vtanh.f32 %v1912_v52  ;;  %v1804_v46 = vpop.f32.mrb[48].mxu0 }
 0x2d2   : > { %v2996_v25 = vpop.eup %2995  ;;  %2307 = vst [vmem:[%s4020_s17 + $0xe0] sm:$0xff] %v2994_v54  ;;  %v1917_v48 = vpop.f32.mrb[48].mxu1  ;;  %3021 = vtanh.f32 %v1801_v20  ;;  %v1805_v27 = vadd.f32 %v1804_v46, %v3992_v29 }
 0x2d3   : > { %v2998_v43 = vpop.eup %2997  ;;  %2309 = vst [vmem:[%s4020_s17 + $0xf0] sm:$0xff] %v2996_v25  ;;  %v1918_v50 = vadd.f32 %v1917_v48, %v3995_v10  ;;  %v1806_v51 = vpop.f32.mrb[49].mxu0  ;;  %3023 = vtanh.f32 %v1914_v42 }
 0x2d4   : > { %v3000_v45 = vpop.eup %2999  ;;  %2308 = vst [vmem:[%s4020_s17 + $0xe8] sm:$0xff] %v2998_v43  ;;  %v1919_v55 = vpop.f32.mrb[49].mxu1  ;;  %v1807_v62 = vadd.f32 %v1806_v51, %v3999_v9  ;;  %3025 = vtanh.f32 %v1805_v27 }
 0x2d5   : > { %v3002_v49 = vpop.eup %3001  ;;  %2310 = vst [vmem:[%s4020_s17 + $0xf8] sm:$0xff] %v3000_v45  ;;  %v1920_v0 = vadd.f32 %v1919_v55, %v4002_v33  ;;  %v1808_v1 = vpop.f32.mrb[50].mxu0  ;;  %3027 = vtanh.f32 %v1918_v50 }
 0x2d6   : > { %v3004_v61 = vpop.eup %3003  ;;  %2314 = vst [vmem:[%s4020_s17 + $0x118] sm:$0xff] %v3002_v49  ;;  %v1921_v2 = vpop.f32.mrb[50].mxu1  ;;  %v1809_v5 = vadd.f32 %v1808_v1, %v3992_v29  ;;  %3029 = vtanh.f32 %v1807_v62 }
 0x2d7   : > { %v3006_v4 = vpop.eup %3005  ;;  %2316 = vst [vmem:[%s4020_s17 + $0x128] sm:$0xff] %v3004_v61  ;;  %v1810_v6 = vpop.f32.mrb[51].mxu0  ;;  %v1922_v11 = vadd.f32 %v1921_v2, %v3995_v10  ;;  %3031 = vtanh.f32 %v1920_v0 }
 0x2d8   : > { %v1923_v7 = vpop.f32.mrb[51].mxu1  ;;  %v3008_v8 = vpop.eup %3007  ;;  %2315 = vst [vmem:[%s4020_s17 + $0x120] sm:$0xff] %v3006_v4  ;;  %v1811_v15 = vadd.f32 %v1810_v6, %v3999_v9  ;;  %3033 = vtanh.f32 %v1809_v5 }
 0x2d9   : > { %v3010_v14 = vpop.eup %3009  ;;  %2317 = vst [vmem:[%s4020_s17 + $0x130] sm:$0xff] %v3008_v8  ;;  %v1924_v19 = vadd.f32 %v1923_v7, %v4002_v33  ;;  %3035 = vtanh.f32 %v1922_v11  ;;  %v1814_v32 = vpop.f32.mrb[52].mxu0 }
 0x2da   : > { %v3012_v16 = vpop.eup %3011  ;;  %2321 = vst [vmem:[%s4020_s17 + $0x150] sm:$0xff] %v3010_v14  ;;  %v1927_v34 = vpop.f32.mrb[52].mxu1  ;;  %3037 = vtanh.f32 %v1811_v15  ;;  %v1815_v60 = vadd.f32 %v1814_v32, %v3992_v29 }
 0x2db   : > { %v3014_v30 = vpop.eup %3013  ;;  %2323 = vst [vmem:[%s4020_s17 + $0x160] sm:$0xff] %v3012_v16  ;;  %v1928_v39 = vadd.f32 %v1927_v34, %v3995_v10  ;;  %v1816_v41 = vpop.f32.mrb[53].mxu0  ;;  %3039 = vtanh.f32 %v1924_v19  ;;  %v1137_v19 = vsub.s32 4, %v3493_v22 }
 0x2dc   : > { %v3016_v59 = vpop.eup %3015  ;;  %2322 = vst [vmem:[%s4020_s17 + $0x158] sm:$0xff] %v3014_v30  ;;  %v1929_v57 = vpop.f32.mrb[53].mxu1  ;;  %v1817_v36 = vadd.f32 %v1816_v41, %v3999_v9  ;;  %3041 = vtanh.f32 %v1815_v60  ;;  %v1141_v60 = vsub.s32 5, %v3493_v22 }
 0x2dd   : > { %v3018_v35 = vpop.eup %3017  ;;  %2324 = vst [vmem:[%s4020_s17 + $0x168] sm:$0xff] %v3016_v59  ;;  %v1930_v37 = vadd.f32 %v1929_v57, %v4002_v33  ;;  %v1818_v40 = vpop.f32.mrb[54].mxu0  ;;  %3043 = vtanh.f32 %v1928_v39 }
 0x2de   : > { %v3020_v17 = vpop.eup %3019  ;;  %2328 = vst [vmem:[%s4020_s17 + $0x188] sm:$0xff] %v3018_v35  ;;  %v1931_v44 = vpop.f32.mrb[54].mxu1  ;;  %v1819_v24 = vadd.f32 %v1818_v40, %v3992_v29  ;;  %3045 = vtanh.f32 %v1817_v36  ;;  %v1145_v40 = vsub.s32 6, %v3493_v22 }
 0x2df   : > { %v3022_v28 = vpop.eup %3021  ;;  %2330 = vst [vmem:[%s4020_s17 + $0x198] sm:$0xff] %v3020_v17  ;;  %v1820_v53 = vpop.f32.mrb[55].mxu0  ;;  %v1932_v63 = vadd.f32 %v1931_v44, %v3995_v10  ;;  %3047 = vtanh.f32 %v1930_v37 }
 0x2e0   : > { %v1933_v56 = vpop.f32.mrb[55].mxu1  ;;  %v3024_v58 = vpop.eup %3023  ;;  %2329 = vst [vmem:[%s4020_s17 + $0x190] sm:$0xff] %v3022_v28  ;;  %v1821_v3 = vadd.f32 %v1820_v53, %v3999_v9  ;;  %3049 = vtanh.f32 %v1819_v24  ;;  %v4125_v24 = vrot.slane %v3987_v13, %v1137_v19 }
 0x2e1   : > { %v3026_v26 = vpop.eup %3025  ;;  %2331 = vst [vmem:[%s4020_s17 + $0x1a0] sm:$0xff] %v3024_v58  ;;  %v1934_v18 = vadd.f32 %v1933_v56, %v4002_v33  ;;  %3051 = vtanh.f32 %v1932_v63  ;;  %v1824_v31 = vpop.f32.mrb[56].mxu0  ;;  %v4130_v56 = vrot.slane %v3987_v13, %v1141_v60  ;;  %v4135_v63 = vrot.slane %v3987_v13, %v1145_v40 }
 0x2e2   : > { %v3028_v12 = vpop.eup %3027  ;;  %2335 = vst [vmem:[%s4020_s17 + $0x1c0] sm:$0xff] %v3026_v26  ;;  %v1937_v38 = vpop.f32.mrb[56].mxu1  ;;  %3053 = vtanh.f32 %v1821_v3  ;;  %v1825_v52 = vadd.f32 %v1824_v31, %v3992_v29 }
 0x2e3   : > { %v3030_v21 = vpop.eup %3029  ;;  %2337 = vst [vmem:[%s4020_s17 + $0x1d0] sm:$0xff] %v3028_v12  ;;  %v1938_v54 = vadd.f32 %v1937_v38, %v3995_v10  ;;  %v1826_v20 = vpop.f32.mrb[57].mxu0  ;;  %3055 = vtanh.f32 %v1934_v18 }
 0x2e4   : > { %v3032_v23 = vpop.eup %3031  ;;  %2336 = vst [vmem:[%s4020_s17 + $0x1c8] sm:$0xff] %v3030_v21  ;;  %v1939_v25 = vpop.f32.mrb[57].mxu1  ;;  %v1827_v43 = vadd.f32 %v1826_v20, %v3999_v9  ;;  %3057 = vtanh.f32 %v1825_v52 }
 0x2e5   : > { %v3034_v47 = vpop.eup %3033  ;;  %2338 = vst [vmem:[%s4020_s17 + $0x1d8] sm:$0xff] %v3032_v23  ;;  %v1940_v45 = vadd.f32 %v1939_v25, %v4002_v33  ;;  %v1828_v46 = vpop.f32.mrb[58].mxu0  ;;  %3059 = vtanh.f32 %v1938_v54 }
 0x2e6   : > { %v3036_v42 = vpop.eup %3035  ;;  %2342 = vst [vmem:[%s4020_s17 + $0x1f8] sm:$0xff] %v3034_v47  ;;  %v1941_v48 = vpop.f32.mrb[58].mxu1  ;;  %v1829_v27 = vadd.f32 %v1828_v46, %v3992_v29  ;;  %3061 = vtanh.f32 %v1827_v43 }
 0x2e7   : > { %v3038_v49 = vpop.eup %3037  ;;  %2344 = vst [vmem:[%s4020_s17 + $0x208] sm:$0xff] %v3036_v42  ;;  %v1830_v50 = vpop.f32.mrb[59].mxu0  ;;  %v1942_v61 = vadd.f32 %v1941_v48, %v3995_v10  ;;  %3063 = vtanh.f32 %v1940_v45 }
 0x2e8   : > { %v1943_v51 = vpop.f32.mrb[59].mxu1  ;;  %v3040_v55 = vpop.eup %3039  ;;  %2343 = vst [vmem:[%s4020_s17 + $0x200] sm:$0xff] %v3038_v49  ;;  %v1831_v0 = vadd.f32 %v1830_v50, %v3999_v9  ;;  %3065 = vtanh.f32 %v1829_v27 }
 0x2e9   : > { %v3042_v62 = vpop.eup %3041  ;;  %2345 = vst [vmem:[%s4020_s17 + $0x210] sm:$0xff] %v3040_v55  ;;  %v1944_v2 = vadd.f32 %v1943_v51, %v4002_v33  ;;  %3067 = vtanh.f32 %v1942_v61  ;;  %v1834_v6 = vpop.f32.mrb[60].mxu0 }
 0x2ea   : > { %v3044_v1 = vpop.eup %3043  ;;  %2349 = vst [vmem:[%s4020_s17 + $0x230] sm:$0xff] %v3042_v62  ;;  %v1947_v7 = vpop.f32.mrb[60].mxu1  ;;  %3069 = vtanh.f32 %v1831_v0  ;;  %v1835_v11 = vadd.f32 %v1834_v6, %v3992_v29 }
 0x2eb   : > { %v3046_v4 = vpop.eup %3045  ;;  %2351 = vst [vmem:[%s4020_s17 + $0x240] sm:$0xff] %v3044_v1  ;;  %v1948_v14 = vadd.f32 %v1947_v7, %v3995_v10  ;;  %v1836_v15 = vpop.f32.mrb[61].mxu0  ;;  %3071 = vtanh.f32 %v1944_v2 }
 0x2ec   : > { %v3048_v5 = vpop.eup %3047  ;;  %2350 = vst [vmem:[%s4020_s17 + $0x238] sm:$0xff] %v3046_v4  ;;  %v1949_v16 = vpop.f32.mrb[61].mxu1  ;;  %v1837_v59 = vadd.f32 %v1836_v15, %v3999_v9  ;;  %3073 = vtanh.f32 %v1835_v11 }
 0x2ed   : > { %v3050_v8 = vpop.eup %3049  ;;  %2352 = vst [vmem:[%s4020_s17 + $0x248] sm:$0xff] %v3048_v5  ;;  %v1950_v32 = vadd.f32 %v1949_v16, %v4002_v33  ;;  %v1838_v34 = vpop.f32.mrb[62].mxu0  ;;  %3075 = vtanh.f32 %v1948_v14 }
 0x2ee   : > { %v3052_v30 = vpop.eup %3051  ;;  %2356 = vst [vmem:[%s4020_s17 + $0x268] sm:$0xff] %v3050_v8  ;;  %v1951_v35 = vpop.f32.mrb[62].mxu1  ;;  %v1839_v41 = vadd.f32 %v1838_v34, %v3992_v29  ;;  %3077 = vtanh.f32 %v1837_v59 }
 0x2ef   : > { %v3054_v39 = vpop.eup %3053  ;;  %2358 = vst [vmem:[%s4020_s17 + $0x278] sm:$0xff] %v3052_v30  ;;  %v1840_v57 = vpop.f32.mrb[63].mxu0  ;;  %v1952_v37 = vadd.f32 %v1951_v35, %v3995_v10  ;;  %3079 = vtanh.f32 %v1950_v32 }
 0x2f0   : > { %v1953_v17 = vpop.f32.mrb[63].mxu1  ;;  %v3056_v36 = vpop.eup %3055  ;;  %2357 = vst [vmem:[%s4020_s17 + $0x270] sm:$0xff] %v3054_v39  ;;  %v1841_v28 = vadd.f32 %v1840_v57, %v3999_v9  ;;  %3081 = vtanh.f32 %v1839_v41 }
 0x2f1   : > { %v3058_v44 = vpop.eup %3057  ;;  %2359 = vst [vmem:[%s4020_s17 + $0x280] sm:$0xff] %v3056_v36  ;;  %v1954_v53 = vadd.f32 %v1953_v17, %v4002_v33  ;;  %3083 = vtanh.f32 %v1952_v37  ;;  %v1990_v9 = vpop.f32.mrb[64].mxu0 }
 0x2f2   : > { %v3060_v29 = vpop.eup %3059  ;;  %2363 = vst [vmem:[%s4020_s17 + $0x2a0] sm:$0xff] %v3058_v44  ;;  %v2663_v58 = vpop.f32.mrb[64].mxu1  ;;  %3085 = vtanh.f32 %v1841_v28  ;;  %v1991_v33 = vadd.f32 %v1990_v9, %v4125_v24 }
 0x2f3   : > { %v3062_v10 = vpop.eup %3061  ;;  %2365 = vst [vmem:[%s4020_s17 + $0x2b0] sm:$0xff] %v3060_v29  ;;  %v1992_v3 = vpop.f32.mrb[65].mxu0  ;;  %3087 = vtanh.f32 %v1954_v53 }
 0x2f4   : > { %v3064_v22 = vpop.eup %3063  ;;  %2364 = vst [vmem:[%s4020_s17 + $0x2a8] sm:$0xff] %v3062_v10  ;;  %v2664_v12 = vpop.f32.mrb[65].mxu1  ;;  %v1993_v21 = vadd.f32 %v1992_v3, %v4130_v56  ;;  %3089 = vtanh.f32 %v1991_v33 }
 0x2f5   : > { %v3066_v26 = vpop.eup %3065  ;;  %2366 = vst [vmem:[%s4020_s17 + $0x2b8] sm:$0xff] %v3064_v22  ;;  %v2665_v23 = vadd.f32 %v2664_v12, %v2663_v58  ;;  %v1994_v31 = vpop.f32.mrb[66].mxu0 }
 0x2f6   : > { %v3068_v18 = vpop.eup %3067  ;;  %2370 = vst [vmem:[%s4020_s17 + $0x2d8] sm:$0xff] %v3066_v26  ;;  %v2666_v38 = vpop.f32.mrb[66].mxu1  ;;  %v1995_v13 = vadd.f32 %v1994_v31, %v4125_v24  ;;  %3091 = vtanh.f32 %v1993_v21 }
 0x2f7   : > { %v3070_v47 = vpop.eup %3069  ;;  %2372 = vst [vmem:[%s4020_s17 + $0x2e8] sm:$0xff] %v3068_v18  ;;  %v1996_v52 = vpop.f32.mrb[67].mxu0  ;;  %v2120_v25 = vadd.f32 %v2665_v23, %v4135_v63 }
 0x2f8   : > { %v2667_v54 = vpop.f32.mrb[67].mxu1  ;;  %v3072_v20 = vpop.eup %3071  ;;  %2371 = vst [vmem:[%s4020_s17 + $0x2e0] sm:$0xff] %v3070_v47  ;;  %v1997_v42 = vadd.f32 %v1996_v52, %v4130_v56  ;;  %3093 = vtanh.f32 %v1995_v13 }
 0x2f9   : > { %v2668_v43 = vadd.f32 %v2667_v54, %v2666_v38  ;;  %v3074_v45 = vpop.eup %3073  ;;  %2373 = vst [vmem:[%s4020_s17 + $0x2f0] sm:$0xff] %v3072_v20  ;;  %3095 = vtanh.f32 %v2120_v25  ;;  %v2000_v50 = vpop.f32.mrb[68].mxu0 }
 0x2fa   : > { %v3076_v46 = vpop.eup %3075  ;;  %2377 = vst [vmem:[%s4020_s17 + $0x310] sm:$0xff] %v3074_v45  ;;  %3097 = vtanh.f32 %v1997_v42  ;;  %v2669_v51 = vpop.f32.mrb[68].mxu1  ;;  %v2001_v61 = vadd.f32 %v2000_v50, %v4125_v24 }
 0x2fb   : > { %v2123_v48 = vadd.f32 %v2668_v43, %v4135_v63  ;;  %v3078_v49 = vpop.eup %3077  ;;  %2379 = vst [vmem:[%s4020_s17 + $0x320] sm:$0xff] %v3076_v46  ;;  %v2002_v62 = vpop.f32.mrb[69].mxu0 }
 0x2fc   : > { %v3080_v27 = vpop.eup %3079  ;;  %2378 = vst [vmem:[%s4020_s17 + $0x318] sm:$0xff] %v3078_v49  ;;  %v2670_v0 = vpop.f32.mrb[69].mxu1  ;;  %v2003_v2 = vadd.f32 %v2002_v62, %v4130_v56 }
 0x2fd   : > { %3099 = vtanh.f32 %v2123_v48  ;;  %v3082_v55 = vpop.eup %3081  ;;  %2380 = vst [vmem:[%s4020_s17 + $0x328] sm:$0xff] %v3080_v27  ;;  %v2671_v4 = vadd.f32 %v2670_v0, %v2669_v51  ;;  %v2004_v5 = vpop.f32.mrb[70].mxu0 }
 0x2fe   : > { %v3084_v1 = vpop.eup %3083  ;;  %2384 = vst [vmem:[%s4020_s17 + $0x348] sm:$0xff] %v3082_v55  ;;  %v2672_v6 = vpop.f32.mrb[70].mxu1  ;;  %3101 = vtanh.f32 %v2001_v61  ;;  %v2005_v8 = vadd.f32 %v2004_v5, %v4125_v24 }
 0x2ff   : > { %v3086_v7 = vpop.eup %3085  ;;  %2386 = vst [vmem:[%s4020_s17 + $0x358] sm:$0xff] %v3084_v1  ;;  %v2006_v11 = vpop.f32.mrb[71].mxu0  ;;  %3103 = vtanh.f32 %v2003_v2  ;;  %v2128_v16 = vadd.f32 %v2671_v4, %v4135_v63 }
 0x300   : > { %v2673_v14 = vpop.f32.mrb[71].mxu1  ;;  %v3088_v15 = vpop.eup %3087  ;;  %2385 = vst [vmem:[%s4020_s17 + $0x350] sm:$0xff] %v3086_v7  ;;  %v2007_v19 = vadd.f32 %v2006_v11, %v4130_v56  ;;  %3105 = vtanh.f32 %v2005_v8 }
 0x301   : > { %v2674_v30 = vadd.f32 %v2673_v14, %v2672_v6  ;;  %v3090_v59 = vpop.eup %3089  ;;  %2387 = vst [vmem:[%s4020_s17 + $0x360] sm:$0xff] %v3088_v15  ;;  %3107 = vtanh.f32 %v2128_v16  ;;  %v2010_v39 = vpop.f32.mrb[72].mxu0 }
 0x302   : > { %v3092_v32 = vpop.eup %3091  ;;  %2282 = vst [vmem:[%s4020_s17 + $0x20] sm:$0xff] %v3090_v59  ;;  %3109 = vtanh.f32 %v2007_v19  ;;  %v2675_v41 = vpop.f32.mrb[72].mxu1  ;;  %v2011_v17 = vadd.f32 %v2010_v39, %v4125_v24 }
 0x303   : > { %v2131_v34 = vadd.f32 %v2674_v30, %v4135_v63  ;;  %v3094_v35 = vpop.eup %3093  ;;  %2283 = vst [vmem:[%s4020_s17 + $0x28] sm:$0xff] %v3092_v32  ;;  %v2012_v36 = vpop.f32.mrb[73].mxu0 }
 0x304   : > { %v3096_v60 = vpop.eup %3095  ;;  %2290 = vst [vmem:[%s4020_s17 + $0x58] sm:$0xff] %v3094_v35  ;;  %v2676_v37 = vpop.f32.mrb[73].mxu1  ;;  %v2013_v44 = vadd.f32 %v2012_v36, %v4130_v56 }
 0x305   : > { %3111 = vtanh.f32 %v2131_v34  ;;  %v3098_v57 = vpop.eup %3097  ;;  %2313 = vst.msk [vmem:[%s4020_s17 + $0x110] sm:$0xff] %vm2284_vm2, %v3096_v60  ;;  %v2677_v28 = vadd.f32 %v2676_v37, %v2675_v41  ;;  %v2014_v29 = vpop.f32.mrb[74].mxu0 }
 0x306   : > { %2291 = vst [vmem:[%s4020_s17 + $0x60] sm:$0xff] %v3098_v57  ;;  %v2678_v53 = vpop.f32.mrb[74].mxu1  ;;  %3113 = vtanh.f32 %v2011_v17  ;;  %v2015_v10 = vadd.f32 %v2014_v29, %v4125_v24  ;;  %v2016_v22 = vpop.f32.mrb[75].mxu0 }
 0x307   : > { %v3100_v40 = vpop.eup %3099  ;;  %v2679_v9 = vpop.f32.mrb[75].mxu1  ;;  %3115 = vtanh.f32 %v2013_v44  ;;  %v2136_v58 = vadd.f32 %v2677_v28, %v4135_v63  ;;  %v2017_v26 = vadd.f32 %v2016_v22, %v4130_v56 }
 0x308   : > { %2320 = vst.msk [vmem:[%s4020_s17 + $0x148] sm:$0xff] %vm2284_vm2, %v3100_v40  ;;  %v2680_v33 = vadd.f32 %v2679_v9, %v2678_v53  ;;  %v3102_v3 = vpop.eup %3101  ;;  %3117 = vtanh.f32 %v2015_v10 }
 0x309   : > { %v3104_v12 = vpop.eup %3103  ;;  %2297 = vst [vmem:[%s4020_s17 + $0x90] sm:$0xff] %v3102_v3  ;;  %3119 = vtanh.f32 %v2136_v58  ;;  %v2020_v31 = vpop.f32.mrb[76].mxu0 }
 0x30a   : > { %v2139_v18 = vadd.f32 %v2680_v33, %v4135_v63  ;;  %v3106_v21 = vpop.eup %3105  ;;  %2298 = vst [vmem:[%s4020_s17 + $0x98] sm:$0xff] %v3104_v12  ;;  %3121 = vtanh.f32 %v2017_v26  ;;  %v2681_v38 = vpop.f32.mrb[76].mxu1  ;;  %v2021_v13 = vadd.f32 %v2020_v31, %v4125_v24 }
 0x30b   : > { %v3108_v23 = vpop.eup %3107  ;;  %2304 = vst [vmem:[%s4020_s17 + $0xc8] sm:$0xff] %v3106_v21  ;;  %v2022_v52 = vpop.f32.mrb[77].mxu0 }
 0x30c   : > { %3123 = vtanh.f32 %v2139_v18  ;;  %v3110_v47 = vpop.eup %3109  ;;  %2327 = vst.msk [vmem:[%s4020_s17 + $0x180] sm:$0xff] %vm2284_vm2, %v3108_v23  ;;  %v2682_v54 = vpop.f32.mrb[77].mxu1  ;;  %v2023_v25 = vadd.f32 %v2022_v52, %v4130_v56 }
 0x30d   : > { %2305 = vst [vmem:[%s4020_s17 + $0xd0] sm:$0xff] %v3110_v47  ;;  %v2683_v42 = vadd.f32 %v2682_v54, %v2681_v38  ;;  %v2024_v43 = vpop.f32.mrb[78].mxu0  ;;  %v2684_v45 = vpop.f32.mrb[78].mxu1  ;;  %3125 = vtanh.f32 %v2021_v13 }
 0x30e   : > { %v2025_v46 = vadd.f32 %v2024_v43, %v4125_v24  ;;  %v2026_v48 = vpop.f32.mrb[79].mxu0  ;;  %v2685_v49 = vpop.f32.mrb[79].mxu1  ;;  %3127 = vtanh.f32 %v2023_v25 }
 0x30f   : > { %v3112_v20 = vpop.eup %3111  ;;  %v2144_v27 = vadd.f32 %v2683_v42, %v4135_v63  ;;  %v2027_v50 = vadd.f32 %v2026_v48, %v4130_v56  ;;  %v2686_v51 = vadd.f32 %v2685_v49, %v2684_v45 }
 0x310   : > { %2334 = vst.msk [vmem:[%s4020_s17 + $0x1b8] sm:$0xff] %vm2284_vm2, %v3112_v20  ;;  %v3114_v55 = vpop.eup %3113  ;;  %3129 = vtanh.f32 %v2025_v46 }
 0x311   : > { %v3116_v61 = vpop.eup %3115  ;;  %2311 = vst [vmem:[%s4020_s17 + $0x100] sm:$0xff] %v3114_v55  ;;  %3131 = vtanh.f32 %v2144_v27  ;;  %v2147_v62 = vadd.f32 %v2686_v51, %v4135_v63  ;;  %v2030_v2 = vpop.f32.mrb[80].mxu0 }
 0x312   : > { %v3118_v0 = vpop.eup %3117  ;;  %2312 = vst [vmem:[%s4020_s17 + $0x108] sm:$0xff] %v3116_v61  ;;  %3133 = vtanh.f32 %v2027_v50  ;;  %v2687_v4 = vpop.f32.mrb[80].mxu1  ;;  %v2031_v6 = vadd.f32 %v2030_v2, %v4125_v24 }
 0x313   : > { %v3120_v1 = vpop.eup %3119  ;;  %2318 = vst [vmem:[%s4020_s17 + $0x138] sm:$0xff] %v3118_v0  ;;  %3135 = vtanh.f32 %v2147_v62  ;;  %v2032_v7 = vpop.f32.mrb[81].mxu0 }
 0x314   : > { %v3122_v5 = vpop.eup %3121  ;;  %2341 = vst.msk [vmem:[%s4020_s17 + $0x1f0] sm:$0xff] %vm2284_vm2, %v3120_v1  ;;  %v2688_v8 = vpop.f32.mrb[81].mxu1  ;;  %v2033_v14 = vadd.f32 %v2032_v7, %v4130_v56  ;;  %3137 = vtanh.f32 %v2031_v6 }
 0x315   : > { %2319 = vst [vmem:[%s4020_s17 + $0x140] sm:$0xff] %v3122_v5  ;;  %v2689_v15 = vadd.f32 %v2688_v8, %v2687_v4  ;;  %v2034_v16 = vpop.f32.mrb[82].mxu0  ;;  %v2690_v19 = vpop.f32.mrb[82].mxu1 }
 0x316   : > { %v3124_v11 = vpop.eup %3123  ;;  %v2035_v30 = vadd.f32 %v2034_v16, %v4125_v24  ;;  %v2036_v59 = vpop.f32.mrb[83].mxu0  ;;  %3139 = vtanh.f32 %v2033_v14 }
 0x317   : > { %2348 = vst.msk [vmem:[%s4020_s17 + $0x228] sm:$0xff] %vm2284_vm2, %v3124_v11  ;;  %v2691_v32 = vpop.f32.mrb[83].mxu1  ;;  %v2152_v34 = vadd.f32 %v2689_v15, %v4135_v63  ;;  %v2037_v35 = vadd.f32 %v2036_v59, %v4130_v56  ;;  %v3126_v39 = vpop.eup %3125 }
 0x318   : > { %v2692_v60 = vadd.f32 %v2691_v32, %v2690_v19  ;;  %3141 = vtanh.f32 %v2035_v30  ;;  %v3128_v41 = vpop.eup %3127  ;;  %2325 = vst [vmem:[%s4020_s17 + $0x170] sm:$0xff] %v3126_v39 }
 0x319   : > { %3143 = vtanh.f32 %v2152_v34  ;;  %2326 = vst [vmem:[%s4020_s17 + $0x178] sm:$0xff] %v3128_v41  ;;  %v2040_v37 = vpop.f32.mrb[84].mxu0  ;;  %v2693_v40 = vpop.f32.mrb[84].mxu1 }
 0x31a   : > { %v2155_v57 = vadd.f32 %v2692_v60, %v4135_v63  ;;  %v3130_v17 = vpop.eup %3129  ;;  %3145 = vtanh.f32 %v2037_v35  ;;  %v2041_v28 = vadd.f32 %v2040_v37, %v4125_v24  ;;  %v2042_v29 = vpop.f32.mrb[85].mxu0 }
 0x31b   : > { %v3132_v36 = vpop.eup %3131  ;;  %2332 = vst [vmem:[%s4020_s17 + $0x1a8] sm:$0xff] %v3130_v17  ;;  %v2694_v53 = vpop.f32.mrb[85].mxu1  ;;  %v2043_v22 = vadd.f32 %v2042_v29, %v4130_v56 }
 0x31c   : > { %3147 = vtanh.f32 %v2155_v57  ;;  %v3134_v44 = vpop.eup %3133  ;;  %2355 = vst.msk [vmem:[%s4020_s17 + $0x260] sm:$0xff] %vm2284_vm2, %v3132_v36  ;;  %v2695_v9 = vadd.f32 %v2694_v53, %v2693_v40  ;;  %v2044_v58 = vpop.f32.mrb[86].mxu0 }
 0x31d   : > { %v3136_v10 = vpop.eup %3135  ;;  %2333 = vst [vmem:[%s4020_s17 + $0x1b0] sm:$0xff] %v3134_v44  ;;  %v2696_v26 = vpop.f32.mrb[86].mxu1  ;;  %3149 = vtanh.f32 %v2041_v28  ;;  %v2045_v33 = vadd.f32 %v2044_v58, %v4125_v24 }
 0x31e   : > { %2362 = vst.msk [vmem:[%s4020_s17 + $0x298] sm:$0xff] %vm2284_vm2, %v3136_v10  ;;  %v2046_v3 = vpop.f32.mrb[87].mxu0  ;;  %v2697_v12 = vpop.f32.mrb[87].mxu1  ;;  %3151 = vtanh.f32 %v2043_v22  ;;  %v2160_v18 = vadd.f32 %v2695_v9, %v4135_v63 }
 0x31f   : > { %v2047_v21 = vadd.f32 %v2046_v3, %v4130_v56  ;;  %v2698_v23 = vadd.f32 %v2697_v12, %v2696_v26  ;;  %v3138_v31 = vpop.eup %3137  ;;  %3153 = vtanh.f32 %v2045_v33 }
 0x320   : > { %v3140_v38 = vpop.eup %3139  ;;  %2339 = vst [vmem:[%s4020_s17 + $0x1e0] sm:$0xff] %v3138_v31  ;;  %3155 = vtanh.f32 %v2160_v18 }
 0x321   : > { %v2163_v47 = vadd.f32 %v2698_v23, %v4135_v63  ;;  %2340 = vst [vmem:[%s4020_s17 + $0x1e8] sm:$0xff] %v3140_v38  ;;  %3157 = vtanh.f32 %v2047_v21  ;;  %v2050_v54 = vpop.f32.mrb[88].mxu0 }
 0x322   : > { %v3142_v13 = vpop.eup %3141  ;;  %v2051_v25 = vadd.f32 %v2050_v54, %v4125_v24  ;;  %v2052_v42 = vpop.f32.mrb[89].mxu0 }
 0x323   : > { %v3144_v52 = vpop.eup %3143  ;;  %2346 = vst [vmem:[%s4020_s17 + $0x218] sm:$0xff] %v3142_v13  ;;  %3159 = vtanh.f32 %v2163_v47  ;;  %v2053_v45 = vadd.f32 %v2052_v42, %v4130_v56  ;;  %v2054_v46 = vpop.f32.mrb[90].mxu0 }
 0x324   : > { %v3146_v20 = vpop.eup %3145  ;;  %2369 = vst.msk [vmem:[%s4020_s17 + $0x2d0] sm:$0xff] %vm2284_vm2, %v3144_v52  ;;  %3161 = vtanh.f32 %v2051_v25  ;;  %v2055_v48 = vadd.f32 %v2054_v46, %v4125_v24  ;;  %v2056_v49 = vpop.f32.mrb[91].mxu0 }
 0x325   : > { %2347 = vst [vmem:[%s4020_s17 + $0x220] sm:$0xff] %v3146_v20  ;;  %3163 = vtanh.f32 %v2053_v45  ;;  %v2057_v27 = vadd.f32 %v2056_v49, %v4130_v56 }
 0x326   : > { %v3148_v43 = vpop.eup %3147  ;;  %3165 = vtanh.f32 %v2055_v48 }
 0x327   : > { %2376 = vst.msk [vmem:[%s4020_s17 + $0x308] sm:$0xff] %vm2284_vm2, %v3148_v43  ;;  %v3150_v50 = vpop.eup %3149  ;;  %3167 = vtanh.f32 %v2057_v27 }
 0x328   : > { %v3152_v51 = vpop.eup %3151  ;;  %2353 = vst [vmem:[%s4020_s17 + $0x250] sm:$0xff] %v3150_v50 }
 0x329   : > { %v3154_v55 = vpop.eup %3153  ;;  %2354 = vst [vmem:[%s4020_s17 + $0x258] sm:$0xff] %v3152_v51  ;;  %v2060_v62 = vpop.f32.mrb[92].mxu0 }
 0x32a   : > { %v3156_v61 = vpop.eup %3155  ;;  %2360 = vst [vmem:[%s4020_s17 + $0x288] sm:$0xff] %v3154_v55  ;;  %v2061_v1 = vadd.f32 %v2060_v62, %v4125_v24  ;;  %v2062_v2 = vpop.f32.mrb[93].mxu0 }
 0x32b   : > { %v3158_v0 = vpop.eup %3157  ;;  %2383 = vst.msk [vmem:[%s4020_s17 + $0x340] sm:$0xff] %vm2284_vm2, %v3156_v61  ;;  %v2063_v5 = vadd.f32 %v2062_v2, %v4130_v56  ;;  %v2064_v6 = vpop.f32.mrb[94].mxu0 }
 0x32c   : > { %2361 = vst [vmem:[%s4020_s17 + $0x290] sm:$0xff] %v3158_v0  ;;  %3169 = vtanh.f32 %v2061_v1  ;;  %v2065_v7 = vadd.f32 %v2064_v6, %v4125_v24  ;;  %v2066_v8 = vpop.f32.mrb[95].mxu0 }
 0x32d   : > { %v3160_v4 = vpop.eup %3159  ;;  %3171 = vtanh.f32 %v2063_v5  ;;  %v2067_v11 = vadd.f32 %v2066_v8, %v4130_v56 }
 0x32e   : > { %2390 = vst.msk [vmem:[%s4020_s17 + $0x378] sm:$0xff] %vm2284_vm2, %v3160_v4  ;;  %v3162_v14 = vpop.eup %3161  ;;  %3173 = vtanh.f32 %v2065_v7 }
 0x32f   : > { %v3164_v15 = vpop.eup %3163  ;;  %2367 = vst [vmem:[%s4020_s17 + $0x2c0] sm:$0xff] %v3162_v14  ;;  %3175 = vtanh.f32 %v2067_v11 }
 0x330   : > { %v3166_v16 = vpop.eup %3165  ;;  %2368 = vst [vmem:[%s4020_s17 + $0x2c8] sm:$0xff] %v3164_v15 }
 0x331   : > { %v3168_v19 = vpop.eup %3167  ;;  %2374 = vst [vmem:[%s4020_s17 + $0x2f8] sm:$0xff] %v3166_v16  ;;  %v2651_v30 = vpop.f32.mrb[96].mxu0 }
 0x332   : > { %2375 = vst [vmem:[%s4020_s17 + $0x300] sm:$0xff] %v3168_v19  ;;  %v2652_v59 = vpop.f32.mrb[97].mxu0 }
 0x333   : > { %v2653_v24 = vadd.f32 %v2652_v59, %v2651_v30  ;;  %v2654_v32 = vpop.f32.mrb[98].mxu0 }
 0x334   : > { %v2655_v34 = vpop.f32.mrb[99].mxu0 }
 0x335   : > { %v2104_v56 = vadd.f32 %v2653_v24, %v4135_v63  ;;  %v2656_v35 = vadd.f32 %v2655_v34, %v2654_v32 }
 0x336   : > { %v3170_v60 = vpop.eup %3169 }
 0x337   : > { %v3172_v39 = vpop.eup %3171  ;;  %2381 = vst [vmem:[%s4020_s17 + $0x330] sm:$0xff] %v3170_v60  ;;  %3177 = vtanh.f32 %v2104_v56  ;;  %v2107_v41 = vadd.f32 %v2656_v35, %v4135_v63 }
 0x338   : > { %v3174_v57 = vpop.eup %3173  ;;  %2382 = vst [vmem:[%s4020_s17 + $0x338] sm:$0xff] %v3172_v39 }
 0x339   : > { %v3176_v17 = vpop.eup %3175  ;;  %2388 = vst [vmem:[%s4020_s17 + $0x368] sm:$0xff] %v3174_v57  ;;  %3179 = vtanh.f32 %v2107_v41  ;;  %v2657_v36 = vpop.f32.mrb[100].mxu0 }
 0x33a   : > { %2389 = vst [vmem:[%s4020_s17 + $0x370] sm:$0xff] %v3176_v17  ;;  %v2658_v37 = vpop.f32.mrb[101].mxu0 }
 0x33b   : > { %v2659_v40 = vadd.f32 %v2658_v37, %v2657_v36  ;;  %v2660_v44 = vpop.f32.mrb[102].mxu0 }
 0x33c   : > { %v2661_v28 = vpop.f32.mrb[103].mxu0 }
 0x33d   : > { %v2112_v29 = vadd.f32 %v2659_v40, %v4135_v63  ;;  %v2662_v53 = vadd.f32 %v2661_v28, %v2660_v44 }
 0x33f   : > { %3181 = vtanh.f32 %v2112_v29  ;;  %v2115_v10 = vadd.f32 %v2662_v53, %v4135_v63 }
 0x341   : > { %v3178_v22 = vpop.eup %3177  ;;  %3183 = vtanh.f32 %v2115_v10 }
 0x342   : > { %2285 = vst.msk [vmem:[%s4020_s17 + $0x30] sm:$0xff] %vm2284_vm2, %v3178_v22 }
 0x343   : > { %v3180_v9 = vpop.eup %3179 }
 0x344   : > { %2292 = vst.msk [vmem:[%s4020_s17 + $0x68] sm:$0xff] %vm2284_vm2, %v3180_v9 }
 0x349   : > { %v3182_v58 = vpop.eup %3181 }
 0x34a   : > { %2299 = vst.msk [vmem:[%s4020_s17 + $0xa0] sm:$0xff] %vm2284_vm2, %v3182_v58 }
 0x34b   : > { %v3184_v26 = vpop.eup %3183 }
 0x34c   : > { %2306 = vst.msk [vmem:[%s4020_s17 + $0xd8] sm:$0xff] %vm2284_vm2, %v3184_v26 }
 0x34d PF: > { %s17_s24 = sadd.s32 1, %s3191_s24  }
 0x34e   : > { %p14_p4 = scmp.ge.s32.totalorder %s17_s24, 4  }
 0x350   :  { %16 = sbr.rel (!%p14_p4) target bundleno = 1 (0x1), region = 78 }

</bundles_post_ra>
